<compile_context>
chip_gen: v5e
topology: v5e:2x2
jax: 0.10.0
libtpu: 0.0.40
codegen_flags: <defaults>
</compile_context>

<pallas_src>
import functools

import jax
import jax.numpy as jnp
from jax.experimental import pallas as pl
from jax.experimental.pallas import tpu as pltpu


# ------------------------------ config ------------------------------------

_LINEAR_TM = 256   # activation rows per grid step; weights stay resident across steps


def _round_up(x, m):
    return ((x + m - 1) // m) * m


@functools.lru_cache(maxsize=1)
def _vmem_limit_bytes():
    """Per-generation VMEM budget: ~3/4 of physical capacity, with a safe cap/fallback."""
    try:
        cap = int(getattr(pltpu.get_tpu_info(), "vmem_capacity_bytes", 0))
        if cap > 0:
            return max(32 << 20, min((cap * 3) // 4, 100 << 20))
    except Exception:
        pass
    return 48 << 20   # conservative: fits v7x's 64 MiB/TC as well as v5e/v6e


# ------------------------------ kernels ------------------------------------

def _linear_kernel(*refs, has_ln, ln_eps, activation, has_residual):
    """y = [LayerNorm](x) @ W + b (+ QuickGELU) (+ residual).

    x block is (tm, K) (full K), W is the full (K, N) weight (resident in VMEM),
    so a single MXU dot per grid step with f32 accumulation; LN prologue and
    bias / QuickGELU / residual epilogue are all fused (no extra HBM traffic).
    """
    it = iter(refs)
    x_ref = next(it)
    w_ref = next(it)
    b_ref = next(it)
    g_ref = bt_ref = r_ref = None
    if has_ln:
        g_ref = next(it)
        bt_ref = next(it)
    if has_residual:
        r_ref = next(it)
    o_ref = next(it)

    x = x_ref[...]
    if has_ln:
        xf = x.astype(jnp.float32)
        mean = jnp.mean(xf, axis=-1, keepdims=True)
        xc = xf - mean
        var = jnp.mean(xc * xc, axis=-1, keepdims=True)   # biased var (PyTorch LayerNorm)
        xn = xc * jax.lax.rsqrt(var + ln_eps) * g_ref[...] + bt_ref[...]
        xb = xn.astype(jnp.bfloat16)
    else:
        xb = x.astype(jnp.bfloat16)

    y = jnp.dot(xb, w_ref[...], preferred_element_type=jnp.float32)   # (tm, N) f32
    y = y + b_ref[...]
    if activation == "quick_gelu":
        y = y * jax.nn.sigmoid(1.702 * y)      # QuickGELU in f32
    if has_residual:
        y = y + r_ref[...].astype(jnp.float32)
    o_ref[...] = y.astype(o_ref.dtype)


def _attention_kernel(qkv_ref, o_ref, *, heads, hd, scale):
    """Per-batch multi-head attention. qkv_ref: (1, S, 3*d) bf16; o_ref: (1, S, d)."""
    d = heads * hd
    qkv = qkv_ref[0]                                      # (S, 3*d) bf16
    # Fold the softmax scale into q once: S*d multiplies instead of S*S per head.
    q = (qkv[:, :d].astype(jnp.float32) * scale).astype(jnp.bfloat16)
    k = qkv[:, d:2 * d]
    v = qkv[:, 2 * d:]
    # TODO(synk): flash-style K-tiled body (or lax.fori_loop over heads) for long
    # sequences / many heads to bound VMEM live ranges, esp. on v7x (64 MiB/TC).
    for h in range(heads):                                # static unrolled head loop
        sl = slice(h * hd, (h + 1) * hd)
        s = jax.lax.dot_general(q[:, sl], k[:, sl], (((1,), (1,)), ((), ())),
                                preferred_element_type=jnp.float32)      # (S, S) f32
        m = jnp.max(s, axis=-1, keepdims=True)
        p = jnp.exp(s - m)
        denom = jnp.sum(p, axis=-1, keepdims=True)
        o_h = jnp.dot(p.astype(jnp.bfloat16), v[:, sl],
                      preferred_element_type=jnp.float32)                # (S, hd) f32
        # Deferred normalization: scale the (S, hd) output, not the (S, S) probs.
        # (approx reciprocal goes to the EUP slot; verify tolerance if bit-closeness
        # against PyTorch softmax is required.)
        o_h = o_h * pl.reciprocal(denom, approx=True)
        o_ref[0, :, sl] = o_h.astype(o_ref.dtype)         # direct per-head store, no concat


# ------------------------------ wrappers ------------------------------------

def pallas_linear(x, w, b, *, ln=None, activation=None, residual=None,
                  out_dtype=jnp.float32):
    """y = [LN](x) @ w + b (+ QuickGELU)(+ residual). x:(M,K), w:(K,N) bf16, b:(1,N) f32."""
    M, K = x.shape
    Kw, N = w.shape
    assert K == Kw and b.shape == (1, N)

    tm = _LINEAR_TM if M > _LINEAR_TM else M
    Mp = _round_up(M, tm)
    xp = x if Mp == M else jnp.pad(x, ((0, Mp - M), (0, 0)))

    operands = [xp, w, b]
    in_specs = [
        pl.BlockSpec((tm, K), lambda i: (i, 0)),          # activation rows (pipelined)
        pl.BlockSpec((K, N), lambda i: (0, 0)),           # full weight: resident in VMEM
        pl.BlockSpec((1, N), lambda i: (0, 0)),           # bias
    ]
    if ln is not None:
        g, bt = ln
        operands += [g, bt]
        in_specs += [pl.BlockSpec((1, K), lambda i: (0, 0)),
                     pl.BlockSpec((1, K), lambda i: (0, 0))]
    if residual is not None:
        rp = residual if Mp == M else jnp.pad(residual, ((0, Mp - M), (0, 0)))
        operands.append(rp)
        in_specs.append(pl.BlockSpec((tm, N), lambda i: (i, 0)))

    out = pl.pallas_call(
        functools.partial(_linear_kernel, has_ln=ln is not None, ln_eps=1e-5,
                          activation=activation, has_residual=residual is not None),
        out_shape=jax.ShapeDtypeStruct((Mp, N), out_dtype),
        grid=(Mp // tm,),
        in_specs=in_specs,
        out_specs=pl.BlockSpec((tm, N), lambda i: (i, 0)),
        compiler_params=pltpu.CompilerParams(
            dimension_semantics=("parallel",),
            vmem_limit_bytes=_vmem_limit_bytes(),
        ),
    )(*operands)

    return out if Mp == M else out[:M]


def pallas_attention(qkv, *, heads):
    """Multi-head self attention. qkv:(B, S, 3*d) -> (B, S, d) bf16."""
    B, S, three_d = qkv.shape
    d = three_d // 3
    hd = d // heads
    scale = float(hd) ** -0.5
    kern = functools.partial(_attention_kernel, heads=heads, hd=hd, scale=scale)
    return pl.pallas_call(
        kern,
        out_shape=jax.ShapeDtypeStruct((B, S, d), jnp.bfloat16),
        grid=(B,),
        in_specs=[pl.BlockSpec((1, S, three_d), lambda bidx: (bidx, 0, 0))],
        out_specs=pl.BlockSpec((1, S, d), lambda bidx: (bidx, 0, 0)),
        compiler_params=pltpu.CompilerParams(
            dimension_semantics=("parallel",),
            vmem_limit_bytes=_vmem_limit_bytes(),
        ),
    )(qkv.astype(jnp.bfloat16))


# ------------------------------ parameters ------------------------------------

def init_params(key, *, width, layers, heads):
    """Weights stored transposed (K, N) in bf16, biases (1, N) f32, LN params (1, D) f32
    — all padding/casting done once here, nothing in the per-call hot path."""
    del heads  # head count only affects the forward pass
    attn_std = width ** -0.5
    fc_std = (2 * width) ** -0.5
    proj_std = (width ** -0.5) * ((2 * layers) ** -0.5)
    keys = jax.random.split(key, layers)
    params = {"layers": []}
    for l in range(layers):
        lk = jax.random.split(keys[l], 4)
        params["layers"].append({
            "ln1_g": jnp.ones((1, width), jnp.float32),
            "ln1_b": jnp.zeros((1, width), jnp.float32),
            "ln2_g": jnp.ones((1, width), jnp.float32),
            "ln2_b": jnp.zeros((1, width), jnp.float32),
            "w_qkv": (attn_std * jax.random.normal(lk[0], (width, 3 * width),
                                                   jnp.float32)).astype(jnp.bfloat16),
            "b_qkv": jnp.zeros((1, 3 * width), jnp.float32),
            "w_out": (proj_std * jax.random.normal(lk[1], (width, width),
                                                   jnp.float32)).astype(jnp.bfloat16),
            "b_out": jnp.zeros((1, width), jnp.float32),
            "w_fc": (fc_std * jax.random.normal(lk[2], (width, 4 * width),
                                                jnp.float32)).astype(jnp.bfloat16),
            "b_fc": jnp.zeros((1, 4 * width), jnp.float32),
            "w_proj": (proj_std * jax.random.normal(lk[3], (4 * width, width),
                                                    jnp.float32)).astype(jnp.bfloat16),
            "b_proj": jnp.zeros((1, width), jnp.float32),
        })
    return params


# ------------------------------ forward ------------------------------------

def transformer_forward(params, x, *, heads):
    """CLIP Transformer forward. x: (S, B, D) seq-first, like nn.MultiheadAttention."""
    # TODO(synk): attn_mask (causal text path) is not supported; this is the
    # attn_mask=None (vision) path of ResidualAttentionBlock.
    S, B, D = x.shape
    # Single layout change for the whole network; residual stream kept in f32.
    flat = jnp.transpose(x, (1, 0, 2)).astype(jnp.float32).reshape(B * S, D)

    for lyr in params["layers"]:
        # --- attention branch: x = x + out_proj(attn(ln_1(x))) ---
        qkv = pallas_linear(flat, lyr["w_qkv"], lyr["b_qkv"],
                            ln=(lyr["ln1_g"], lyr["ln1_b"]),
                            out_dtype=jnp.bfloat16)                 # fused LN1 + QKV
        attn = pallas_attention(qkv.reshape(B, S, 3 * D), heads=heads)
        flat = pallas_linear(attn.reshape(B * S, D), lyr["w_out"], lyr["b_out"],
                             residual=flat, out_dtype=jnp.float32)  # fused residual

        # --- MLP branch: x = x + c_proj(QuickGELU(c_fc(ln_2(x)))) ---
        h = pallas_linear(flat, lyr["w_fc"], lyr["b_fc"],
                          ln=(lyr["ln2_g"], lyr["ln2_b"]),
                          activation="quick_gelu",
                          out_dtype=jnp.bfloat16)                   # fused LN2 + c_fc + GELU
        flat = pallas_linear(h, lyr["w_proj"], lyr["b_proj"],
                             residual=flat, out_dtype=jnp.float32)  # fused residual

    out = flat.reshape(B, S, D).transpose(1, 0, 2)   # back to (S, B, D)
    return out.astype(x.dtype)


# ------------------------------ main ------------------------------------

if __name__ == "__main__":
    # small but shape-consistent config: seq=8, batch=2, width=32, 4 heads, 2 layers
    S, B, width, heads, layers = 8, 2, 32, 4, 2

    key = jax.random.PRNGKey(0)
    pkey, xkey = jax.random.split(key)
    params = init_params(pkey, width=width, layers=layers, heads=heads)
    x = jax.random.normal(xkey, (S, B, width), jnp.float32)

    fwd = jax.jit(functools.partial(transformer_forward, heads=heads))
    out = fwd(params, x)
    out = jax.block_until_ready(out)

    assert out.shape == (S, B, width)
    assert bool(jnp.all(jnp.isfinite(out)))
    print("KERNEL_OK")
</pallas_src>

<mosaic_0001>
module attributes {stable_mosaic.version = 11 : i64} {
  func.func @_linear_kernel(%arg0: i32, %arg1: memref<16x32xbf16, #tpu.memory_space<vmem>>, %arg2: memref<32x32xbf16, #tpu.memory_space<vmem>>, %arg3: memref<1x32xf32, #tpu.memory_space<vmem>>, %arg4: memref<16x32xf32, #tpu.memory_space<vmem>>, %arg5: memref<16x32xf32, #tpu.memory_space<vmem>>) attributes {dimension_semantics = [#tpu.dimension_semantics<parallel>], iteration_bounds = array<i64: 1>, scalar_prefetch = 0 : i64, scratch_operands = 0 : i64, tpu.core_type = #tpu.core_type<tc>, window_params = [{transform_indices = @transform_0, window_bounds = array<i64: 16, 32>}, {pipeline_mode = #tpu.pipeline_mode<synchronous>, transform_indices = @transform_1, window_bounds = array<i64: 32, 32>}, {pipeline_mode = #tpu.pipeline_mode<synchronous>, transform_indices = @transform_2, window_bounds = array<i64: 1, 32>}, {transform_indices = @transform_3, window_bounds = array<i64: 16, 32>}, {transform_indices = @transform_4, window_bounds = array<i64: 16, 32>}]} {
    %c0 = arith.constant 0 : index
    %c0_0 = arith.constant 0 : index
    %0 = vector.load %arg1[%c0, %c0_0] : memref<16x32xbf16, #tpu.memory_space<vmem>>, vector<16x32xbf16>
    %c0_1 = arith.constant 0 : index
    %c0_2 = arith.constant 0 : index
    %1 = vector.load %arg2[%c0_1, %c0_2] : memref<32x32xbf16, #tpu.memory_space<vmem>>, vector<32x32xbf16>
    %cst = arith.constant dense<0.000000e+00> : vector<16x32xf32>
    %2 = tpu.matmul %0, %1, %cst {dimension_numbers = #tpu.dot_dimension_numbers<[1], [0], [0], [1], [0, 0, 1, 1], [], []>} : vector<16x32xbf16>, vector<32x32xbf16>, vector<16x32xf32> -> vector<16x32xf32>
    %c0_3 = arith.constant 0 : index
    %c0_4 = arith.constant 0 : index
    %3 = vector.load %arg3[%c0_3, %c0_4] : memref<1x32xf32, #tpu.memory_space<vmem>>, vector<1x32xf32>
    %4 = vector.broadcast %3 : vector<1x32xf32> to vector<16x32xf32>
    %5 = arith.addf %2, %4 : vector<16x32xf32>
    %c0_5 = arith.constant 0 : index
    %c0_6 = arith.constant 0 : index
    %6 = vector.load %arg4[%c0_5, %c0_6] : memref<16x32xf32, #tpu.memory_space<vmem>>, vector<16x32xf32>
    %7 = arith.addf %5, %6 : vector<16x32xf32>
    %c0_7 = arith.constant 0 : index
    %c0_8 = arith.constant 0 : index
    %8 = vector.load %arg5[%c0_7, %c0_8] : memref<16x32xf32, #tpu.memory_space<vmem>>, vector<16x32xf32>
    tpu.vector_store %arg5[%c0_7, %c0_8], %7 {strides = array<i32>} : memref<16x32xf32, #tpu.memory_space<vmem>>, vector<16x32xf32>,
    return
  }
  func.func @transform_0(%arg0: i32) -> (i32, i32) {
    %c0_i32 = arith.constant 0 : i32
    %c0_i32_0 = arith.constant 0 : i32
    return %arg0, %c0_i32 : i32, i32
  }
  func.func @transform_1(%arg0: i32) -> (i32, i32) {
    %c0_i32 = arith.constant 0 : i32
    %c0_i32_0 = arith.constant 0 : i32
    %c0_i32_1 = arith.constant 0 : i32
    return %c0_i32, %c0_i32_0 : i32, i32
  }
  func.func @transform_2(%arg0: i32) -> (i32, i32) {
    %c0_i32 = arith.constant 0 : i32
    %c0_i32_0 = arith.constant 0 : i32
    %c0_i32_1 = arith.constant 0 : i32
    return %c0_i32, %c0_i32_0 : i32, i32
  }
  func.func @transform_3(%arg0: i32) -> (i32, i32) {
    %c0_i32 = arith.constant 0 : i32
    %c0_i32_0 = arith.constant 0 : i32
    return %arg0, %c0_i32 : i32, i32
  }
  func.func @transform_4(%arg0: i32) -> (i32, i32) {
    %c0_i32 = arith.constant 0 : i32
    %c0_i32_0 = arith.constant 0 : i32
    return %arg0, %c0_i32 : i32, i32
  }
}

module attributes {stable_mosaic.version = 11 : i64} {
  func.func @_attention_kernel(%arg0: i32, %arg1: memref<1x8x96xbf16, #tpu.memory_space<vmem>>, %arg2: memref<1x8x32xbf16, #tpu.memory_space<vmem>>) attributes {dimension_semantics = [#tpu.dimension_semantics<parallel>], iteration_bounds = array<i64: 2>, scalar_prefetch = 0 : i64, scratch_operands = 0 : i64, tpu.core_type = #tpu.core_type<tc>, window_params = [{transform_indices = @transform_0, window_bounds = array<i64: 1, 8, 96>}, {transform_indices = @transform_1, window_bounds = array<i64: 1, 8, 32>}]} {
    %c0 = arith.constant 0 : index
    %c0_0 = arith.constant 0 : index
    %c0_1 = arith.constant 0 : index
    %0 = vector.load %arg1[%c0, %c0_0, %c0_1] : memref<1x8x96xbf16, #tpu.memory_space<vmem>>, vector<1x8x96xbf16>
    %1 = vector.shape_cast %0 : vector<1x8x96xbf16> to vector<8x96xbf16>
    %2 = vector.extract_strided_slice %1 {offsets = [0, 0], sizes = [8, 32], strides = [1, 1]} : vector<8x96xbf16> to vector<8x32xbf16>
    %3 = arith.extf %2 : vector<8x32xbf16> to vector<8x32xf32>
    %cst = arith.constant 0.353553385 : f32
    %4 = vector.broadcast %cst : f32 to vector<8x32xf32>
    %5 = arith.mulf %3, %4 : vector<8x32xf32>
    %6 = arith.truncf %5 : vector<8x32xf32> to vector<8x32xbf16>
    %7 = vector.extract_strided_slice %1 {offsets = [0, 32], sizes = [8, 32], strides = [1, 1]} : vector<8x96xbf16> to vector<8x32xbf16>
    %8 = vector.extract_strided_slice %1 {offsets = [0, 64], sizes = [8, 32], strides = [1, 1]} : vector<8x96xbf16> to vector<8x32xbf16>
    %9 = vector.extract_strided_slice %6 {offsets = [0, 0], sizes = [8, 8], strides = [1, 1]} : vector<8x32xbf16> to vector<8x8xbf16>
    %10 = vector.extract_strided_slice %7 {offsets = [0, 0], sizes = [8, 8], strides = [1, 1]} : vector<8x32xbf16> to vector<8x8xbf16>
    %cst_2 = arith.constant dense<0.000000e+00> : vector<8x8xf32>
    %11 = tpu.matmul %9, %10, %cst_2 {dimension_numbers = #tpu.dot_dimension_numbers<[1], [1], [0], [0], [0, 0, 1, 0], [], []>} : vector<8x8xbf16>, vector<8x8xbf16>, vector<8x8xf32> -> vector<8x8xf32>
    %cst_3 = arith.constant dense<0xFF800000> : vector<8xf32>
    %12 = vector.multi_reduction <maximumf>, %11, %cst_3 [1] : vector<8x8xf32> to vector<8xf32>
    %13 = vector.shape_cast %12 : vector<8xf32> to vector<8x1xf32>
    %14 = vector.broadcast %13 : vector<8x1xf32> to vector<8x8xf32>
    %15 = arith.subf %11, %14 : vector<8x8xf32>
    %16 = math.exp %15 : vector<8x8xf32>
    %cst_4 = arith.constant dense<0.000000e+00> : vector<8xf32>
    %17 = vector.multi_reduction <add>, %16, %cst_4 [1] : vector<8x8xf32> to vector<8xf32>
    %18 = vector.shape_cast %17 : vector<8xf32> to vector<8x1xf32>
    %19 = arith.truncf %16 : vector<8x8xf32> to vector<8x8xbf16>
    %20 = vector.extract_strided_slice %8 {offsets = [0, 0], sizes = [8, 8], strides = [1, 1]} : vector<8x32xbf16> to vector<8x8xbf16>
    %cst_5 = arith.constant dense<0.000000e+00> : vector<8x8xf32>
    %21 = tpu.matmul %19, %20, %cst_5 {dimension_numbers = #tpu.dot_dimension_numbers<[1], [0], [0], [1], [0, 0, 1, 1], [], []>} : vector<8x8xbf16>, vector<8x8xbf16>, vector<8x8xf32> -> vector<8x8xf32>
    %22 = tpu.reciprocal %18 {approx = true} : vector<8x1xf32> -> vector<8x1xf32>
    %23 = vector.broadcast %22 : vector<8x1xf32> to vector<8x8xf32>
    %24 = arith.mulf %21, %23 : vector<8x8xf32>
    %25 = arith.truncf %24 : vector<8x8xf32> to vector<8x8xbf16>
    %c0_6 = arith.constant 0 : index
    %c0_7 = arith.constant 0 : index
    %c0_8 = arith.constant 0 : index
    %26 = vector.load %arg2[%c0_6, %c0_7, %c0_8] : memref<1x8x32xbf16, #tpu.memory_space<vmem>>, vector<1x8x8xbf16>
    %27 = vector.shape_cast %26 : vector<1x8x8xbf16> to vector<8x8xbf16>
    %28 = vector.shape_cast %25 : vector<8x8xbf16> to vector<1x8x8xbf16>
    tpu.vector_store %arg2[%c0_6, %c0_7, %c0_8], %28 {strides = array<i32>} : memref<1x8x32xbf16, #tpu.memory_space<vmem>>, vector<1x8x8xbf16>,
    %29 = vector.extract_strided_slice %6 {offsets = [0, 8], sizes = [8, 8], strides = [1, 1]} : vector<8x32xbf16> to vector<8x8xbf16>
    %30 = vector.extract_strided_slice %7 {offsets = [0, 8], sizes = [8, 8], strides = [1, 1]} : vector<8x32xbf16> to vector<8x8xbf16>
    %cst_9 = arith.constant dense<0.000000e+00> : vector<8x8xf32>
    %31 = tpu.matmul %29, %30, %cst_9 {dimension_numbers = #tpu.dot_dimension_numbers<[1], [1], [0], [0], [0, 0, 1, 0], [], []>} : vector<8x8xbf16>, vector<8x8xbf16>, vector<8x8xf32> -> vector<8x8xf32>
    %cst_10 = arith.constant dense<0xFF800000> : vector<8xf32>
    %32 = vector.multi_reduction <maximumf>, %31, %cst_10 [1] : vector<8x8xf32> to vector<8xf32>
    %33 = vector.shape_cast %32 : vector<8xf32> to vector<8x1xf32>
    %34 = vector.broadcast %33 : vector<8x1xf32> to vector<8x8xf32>
    %35 = arith.subf %31, %34 : vector<8x8xf32>
    %36 = math.exp %35 : vector<8x8xf32>
    %cst_11 = arith.constant dense<0.000000e+00> : vector<8xf32>
    %37 = vector.multi_reduction <add>, %36, %cst_11 [1] : vector<8x8xf32> to vector<8xf32>
    %38 = vector.shape_cast %37 : vector<8xf32> to vector<8x1xf32>
    %39 = arith.truncf %36 : vector<8x8xf32> to vector<8x8xbf16>
    %40 = vector.extract_strided_slice %8 {offsets = [0, 8], sizes = [8, 8], strides = [1, 1]} : vector<8x32xbf16> to vector<8x8xbf16>
    %cst_12 = arith.constant dense<0.000000e+00> : vector<8x8xf32>
    %41 = tpu.matmul %39, %40, %cst_12 {dimension_numbers = #tpu.dot_dimension_numbers<[1], [0], [0], [1], [0, 0, 1, 1], [], []>} : vector<8x8xbf16>, vector<8x8xbf16>, vector<8x8xf32> -> vector<8x8xf32>
    %42 = tpu.reciprocal %38 {approx = true} : vector<8x1xf32> -> vector<8x1xf32>
    %43 = vector.broadcast %42 : vector<8x1xf32> to vector<8x8xf32>
    %44 = arith.mulf %41, %43 : vector<8x8xf32>
    %45 = arith.truncf %44 : vector<8x8xf32> to vector<8x8xbf16>
    %c0_13 = arith.constant 0 : index
    %c0_14 = arith.constant 0 : index
    %c8 = arith.constant 8 : index
    %46 = vector.load %arg2[%c0_13, %c0_14, %c8] : memref<1x8x32xbf16, #tpu.memory_space<vmem>>, vector<1x8x8xbf16>
    %47 = vector.shape_cast %46 : vector<1x8x8xbf16> to vector<8x8xbf16>
    %48 = vector.shape_cast %45 : vector<8x8xbf16> to vector<1x8x8xbf16>
    tpu.vector_store %arg2[%c0_13, %c0_14, %c8], %48 {strides = array<i32>} : memref<1x8x32xbf16, #tpu.memory_space<vmem>>, vector<1x8x8xbf16>,
    %49 = vector.extract_strided_slice %6 {offsets = [0, 16], sizes = [8, 8], strides = [1, 1]} : vector<8x32xbf16> to vector<8x8xbf16>
    %50 = vector.extract_strided_slice %7 {offsets = [0, 16], sizes = [8, 8], strides = [1, 1]} : vector<8x32xbf16> to vector<8x8xbf16>
    %cst_15 = arith.constant dense<0.000000e+00> : vector<8x8xf32>
    %51 = tpu.matmul %49, %50, %cst_15 {dimension_numbers = #tpu.dot_dimension_numbers<[1], [1], [0], [0], [0, 0, 1, 0], [], []>} : vector<8x8xbf16>, vector<8x8xbf16>, vector<8x8xf32> -> vector<8x8xf32>
    %cst_16 = arith.constant dense<0xFF800000> : vector<8xf32>
    %52 = vector.multi_reduction <maximumf>, %51, %cst_16 [1] : vector<8x8xf32> to vector<8xf32>
    %53 = vector.shape_cast %52 : vector<8xf32> to vector<8x1xf32>
    %54 = vector.broadcast %53 : vector<8x1xf32> to vector<8x8xf32>
    %55 = arith.subf %51, %54 : vector<8x8xf32>
    %56 = math.exp %55 : vector<8x8xf32>
    %cst_17 = arith.constant dense<0.000000e+00> : vector<8xf32>
    %57 = vector.multi_reduction <add>, %56, %cst_17 [1] : vector<8x8xf32> to vector<8xf32>
    %58 = vector.shape_cast %57 : vector<8xf32> to vector<8x1xf32>
    %59 = arith.truncf %56 : vector<8x8xf32> to vector<8x8xbf16>
    %60 = vector.extract_strided_slice %8 {offsets = [0, 16], sizes = [8, 8], strides = [1, 1]} : vector<8x32xbf16> to vector<8x8xbf16>
    %cst_18 = arith.constant dense<0.000000e+00> : vector<8x8xf32>
    %61 = tpu.matmul %59, %60, %cst_18 {dimension_numbers = #tpu.dot_dimension_numbers<[1], [0], [0], [1], [0, 0, 1, 1], [], []>} : vector<8x8xbf16>, vector<8x8xbf16>, vector<8x8xf32> -> vector<8x8xf32>
    %62 = tpu.reciprocal %58 {approx = true} : vector<8x1xf32> -> vector<8x1xf32>
    %63 = vector.broadcast %62 : vector<8x1xf32> to vector<8x8xf32>
    %64 = arith.mulf %61, %63 : vector<8x8xf32>
    %65 = arith.truncf %64 : vector<8x8xf32> to vector<8x8xbf16>
    %c0_19 = arith.constant 0 : index
    %c0_20 = arith.constant 0 : index
    %c16 = arith.constant 16 : index
    %66 = vector.load %arg2[%c0_19, %c0_20, %c16] : memref<1x8x32xbf16, #tpu.memory_space<vmem>>, vector<1x8x8xbf16>
    %67 = vector.shape_cast %66 : vector<1x8x8xbf16> to vector<8x8xbf16>
    %68 = vector.shape_cast %65 : vector<8x8xbf16> to vector<1x8x8xbf16>
    tpu.vector_store %arg2[%c0_19, %c0_20, %c16], %68 {strides = array<i32>} : memref<1x8x32xbf16, #tpu.memory_space<vmem>>, vector<1x8x8xbf16>,
    %69 = vector.extract_strided_slice %6 {offsets = [0, 24], sizes = [8, 8], strides = [1, 1]} : vector<8x32xbf16> to vector<8x8xbf16>
    %70 = vector.extract_strided_slice %7 {offsets = [0, 24], sizes = [8, 8], strides = [1, 1]} : vector<8x32xbf16> to vector<8x8xbf16>
    %cst_21 = arith.constant dense<0.000000e+00> : vector<8x8xf32>
    %71 = tpu.matmul %69, %70, %cst_21 {dimension_numbers = #tpu.dot_dimension_numbers<[1], [1], [0], [0], [0, 0, 1, 0], [], []>} : vector<8x8xbf16>, vector<8x8xbf16>, vector<8x8xf32> -> vector<8x8xf32>
    %cst_22 = arith.constant dense<0xFF800000> : vector<8xf32>
    %72 = vector.multi_reduction <maximumf>, %71, %cst_22 [1] : vector<8x8xf32> to vector<8xf32>
    %73 = vector.shape_cast %72 : vector<8xf32> to vector<8x1xf32>
    %74 = vector.broadcast %73 : vector<8x1xf32> to vector<8x8xf32>
    %75 = arith.subf %71, %74 : vector<8x8xf32>
    %76 = math.exp %75 : vector<8x8xf32>
    %cst_23 = arith.constant dense<0.000000e+00> : vector<8xf32>
    %77 = vector.multi_reduction <add>, %76, %cst_23 [1] : vector<8x8xf32> to vector<8xf32>
    %78 = vector.shape_cast %77 : vector<8xf32> to vector<8x1xf32>
    %79 = arith.truncf %76 : vector<8x8xf32> to vector<8x8xbf16>
    %80 = vector.extract_strided_slice %8 {offsets = [0, 24], sizes = [8, 8], strides = [1, 1]} : vector<8x32xbf16> to vector<8x8xbf16>
    %cst_24 = arith.constant dense<0.000000e+00> : vector<8x8xf32>
    %81 = tpu.matmul %79, %80, %cst_24 {dimension_numbers = #tpu.dot_dimension_numbers<[1], [0], [0], [1], [0, 0, 1, 1], [], []>} : vector<8x8xbf16>, vector<8x8xbf16>, vector<8x8xf32> -> vector<8x8xf32>
    %82 = tpu.reciprocal %78 {approx = true} : vector<8x1xf32> -> vector<8x1xf32>
    %83 = vector.broadcast %82 : vector<8x1xf32> to vector<8x8xf32>
    %84 = arith.mulf %81, %83 : vector<8x8xf32>
    %85 = arith.truncf %84 : vector<8x8xf32> to vector<8x8xbf16>
    %c0_25 = arith.constant 0 : index
    %c0_26 = arith.constant 0 : index
    %c24 = arith.constant 24 : index
    %86 = vector.load %arg2[%c0_25, %c0_26, %c24] : memref<1x8x32xbf16, #tpu.memory_space<vmem>>, vector<1x8x8xbf16>
    %87 = vector.shape_cast %86 : vector<1x8x8xbf16> to vector<8x8xbf16>
    %88 = vector.shape_cast %85 : vector<8x8xbf16> to vector<1x8x8xbf16>
    tpu.vector_store %arg2[%c0_25, %c0_26, %c24], %88 {strides = array<i32>} : memref<1x8x32xbf16, #tpu.memory_space<vmem>>, vector<1x8x8xbf16>,
    return
  }
  func.func @transform_0(%arg0: i32) -> (i32, i32, i32) {
    %c0_i32 = arith.constant 0 : i32
    %c0_i32_0 = arith.constant 0 : i32
    %c0_i32_1 = arith.constant 0 : i32
    return %arg0, %c0_i32, %c0_i32_0 : i32, i32, i32
  }
  func.func @transform_1(%arg0: i32) -> (i32, i32, i32) {
    %c0_i32 = arith.constant 0 : i32
    %c0_i32_0 = arith.constant 0 : i32
    %c0_i32_1 = arith.constant 0 : i32
    return %arg0, %c0_i32, %c0_i32_0 : i32, i32, i32
  }
}

module attributes {stable_mosaic.version = 11 : i64} {
  func.func @_linear_kernel(%arg0: i32, %arg1: memref<16x32xf32, #tpu.memory_space<vmem>>, %arg2: memref<32x96xbf16, #tpu.memory_space<vmem>>, %arg3: memref<1x96xf32, #tpu.memory_space<vmem>>, %arg4: memref<1x32xf32, #tpu.memory_space<vmem>>, %arg5: memref<1x32xf32, #tpu.memory_space<vmem>>, %arg6: memref<16x96xbf16, #tpu.memory_space<vmem>>) attributes {dimension_semantics = [#tpu.dimension_semantics<parallel>], iteration_bounds = array<i64: 1>, scalar_prefetch = 0 : i64, scratch_operands = 0 : i64, tpu.core_type = #tpu.core_type<tc>, window_params = [{transform_indices = @transform_0, window_bounds = array<i64: 16, 32>}, {pipeline_mode = #tpu.pipeline_mode<synchronous>, transform_indices = @transform_1, window_bounds = array<i64: 32, 96>}, {pipeline_mode = #tpu.pipeline_mode<synchronous>, transform_indices = @transform_2, window_bounds = array<i64: 1, 96>}, {pipeline_mode = #tpu.pipeline_mode<synchronous>, transform_indices = @transform_3, window_bounds = array<i64: 1, 32>}, {pipeline_mode = #tpu.pipeline_mode<synchronous>, transform_indices = @transform_4, window_bounds = array<i64: 1, 32>}, {transform_indices = @transform_5, window_bounds = array<i64: 16, 96>}]} {
    %c0 = arith.constant 0 : index
    %c0_0 = arith.constant 0 : index
    %0 = vector.load %arg1[%c0, %c0_0] : memref<16x32xf32, #tpu.memory_space<vmem>>, vector<16x32xf32>
    %cst = arith.constant dense<0.000000e+00> : vector<16xf32>
    %1 = vector.multi_reduction <add>, %0, %cst [1] : vector<16x32xf32> to vector<16xf32>
    %2 = vector.shape_cast %1 : vector<16xf32> to vector<16x1xf32>
    %cst_1 = arith.constant 3.200000e+01 : f32
    %3 = vector.broadcast %cst_1 : f32 to vector<16x1xf32>
    %4 = arith.divf %2, %3 : vector<16x1xf32>
    %5 = vector.broadcast %4 : vector<16x1xf32> to vector<16x32xf32>
    %6 = arith.subf %0, %5 : vector<16x32xf32>
    %7 = arith.mulf %6, %6 : vector<16x32xf32>
    %cst_2 = arith.constant dense<0.000000e+00> : vector<16xf32>
    %8 = vector.multi_reduction <add>, %7, %cst_2 [1] : vector<16x32xf32> to vector<16xf32>
    %9 = vector.shape_cast %8 : vector<16xf32> to vector<16x1xf32>
    %cst_3 = arith.constant 3.200000e+01 : f32
    %10 = vector.broadcast %cst_3 : f32 to vector<16x1xf32>
    %11 = arith.divf %9, %10 : vector<16x1xf32>
    %cst_4 = arith.constant 9.99999974E-6 : f32
    %12 = vector.broadcast %cst_4 : f32 to vector<16x1xf32>
    %13 = arith.addf %11, %12 : vector<16x1xf32>
    %14 = math.rsqrt %13 : vector<16x1xf32>
    %15 = vector.broadcast %14 : vector<16x1xf32> to vector<16x32xf32>
    %16 = arith.mulf %6, %15 : vector<16x32xf32>
    %c0_5 = arith.constant 0 : index
    %c0_6 = arith.constant 0 : index
    %17 = vector.load %arg4[%c0_5, %c0_6] : memref<1x32xf32, #tpu.memory_space<vmem>>, vector<1x32xf32>
    %18 = vector.broadcast %17 : vector<1x32xf32> to vector<16x32xf32>
    %19 = arith.mulf %16, %18 : vector<16x32xf32>
    %c0_7 = arith.constant 0 : index
    %c0_8 = arith.constant 0 : index
    %20 = vector.load %arg5[%c0_7, %c0_8] : memref<1x32xf32, #tpu.memory_space<vmem>>, vector<1x32xf32>
    %21 = vector.broadcast %20 : vector<1x32xf32> to vector<16x32xf32>
    %22 = arith.addf %19, %21 : vector<16x32xf32>
    %23 = arith.truncf %22 : vector<16x32xf32> to vector<16x32xbf16>
    %c0_9 = arith.constant 0 : index
    %c0_10 = arith.constant 0 : index
    %24 = vector.load %arg2[%c0_9, %c0_10] : memref<32x96xbf16, #tpu.memory_space<vmem>>, vector<32x96xbf16>
    %cst_11 = arith.constant dense<0.000000e+00> : vector<16x96xf32>
    %25 = tpu.matmul %23, %24, %cst_11 {dimension_numbers = #tpu.dot_dimension_numbers<[1], [0], [0], [1], [0, 0, 1, 1], [], []>} : vector<16x32xbf16>, vector<32x96xbf16>, vector<16x96xf32> -> vector<16x96xf32>
    %c0_12 = arith.constant 0 : index
    %c0_13 = arith.constant 0 : index
    %26 = vector.load %arg3[%c0_12, %c0_13] : memref<1x96xf32, #tpu.memory_space<vmem>>, vector<1x96xf32>
    %27 = vector.broadcast %26 : vector<1x96xf32> to vector<16x96xf32>
    %28 = arith.addf %25, %27 : vector<16x96xf32>
    %29 = arith.truncf %28 : vector<16x96xf32> to vector<16x96xbf16>
    %c0_14 = arith.constant 0 : index
    %c0_15 = arith.constant 0 : index
    %30 = vector.load %arg6[%c0_14, %c0_15] : memref<16x96xbf16, #tpu.memory_space<vmem>>, vector<16x96xbf16>
    tpu.vector_store %arg6[%c0_14, %c0_15], %29 {strides = array<i32>} : memref<16x96xbf16, #tpu.memory_space<vmem>>, vector<16x96xbf16>,
    return
  }
  func.func @transform_0(%arg0: i32) -> (i32, i32) {
    %c0_i32 = arith.constant 0 : i32
    %c0_i32_0 = arith.constant 0 : i32
    return %arg0, %c0_i32 : i32, i32
  }
  func.func @transform_1(%arg0: i32) -> (i32, i32) {
    %c0_i32 = arith.constant 0 : i32
    %c0_i32_0 = arith.constant 0 : i32
    %c0_i32_1 = arith.constant 0 : i32
    return %c0_i32, %c0_i32_0 : i32, i32
  }
  func.func @transform_2(%arg0: i32) -> (i32, i32) {
    %c0_i32 = arith.constant 0 : i32
    %c0_i32_0 = arith.constant 0 : i32
    %c0_i32_1 = arith.constant 0 : i32
    return %c0_i32, %c0_i32_0 : i32, i32
  }
  func.func @transform_3(%arg0: i32) -> (i32, i32) {
    %c0_i32 = arith.constant 0 : i32
    %c0_i32_0 = arith.constant 0 : i32
    %c0_i32_1 = arith.constant 0 : i32
    return %c0_i32, %c0_i32_0 : i32, i32
  }
  func.func @transform_4(%arg0: i32) -> (i32, i32) {
    %c0_i32 = arith.constant 0 : i32
    %c0_i32_0 = arith.constant 0 : i32
    %c0_i32_1 = arith.constant 0 : i32
    return %c0_i32, %c0_i32_0 : i32, i32
  }
  func.func @transform_5(%arg0: i32) -> (i32, i32) {
    %c0_i32 = arith.constant 0 : i32
    %c0_i32_0 = arith.constant 0 : i32
    return %arg0, %c0_i32 : i32, i32
  }
}

module attributes {stable_mosaic.version = 11 : i64} {
  func.func @_linear_kernel(%arg0: i32, %arg1: memref<16x32xf32, #tpu.memory_space<vmem>>, %arg2: memref<32x128xbf16, #tpu.memory_space<vmem>>, %arg3: memref<1x128xf32, #tpu.memory_space<vmem>>, %arg4: memref<1x32xf32, #tpu.memory_space<vmem>>, %arg5: memref<1x32xf32, #tpu.memory_space<vmem>>, %arg6: memref<16x128xbf16, #tpu.memory_space<vmem>>) attributes {dimension_semantics = [#tpu.dimension_semantics<parallel>], iteration_bounds = array<i64: 1>, scalar_prefetch = 0 : i64, scratch_operands = 0 : i64, tpu.core_type = #tpu.core_type<tc>, window_params = [{transform_indices = @transform_0, window_bounds = array<i64: 16, 32>}, {pipeline_mode = #tpu.pipeline_mode<synchronous>, transform_indices = @transform_1, window_bounds = array<i64: 32, 128>}, {pipeline_mode = #tpu.pipeline_mode<synchronous>, transform_indices = @transform_2, window_bounds = array<i64: 1, 128>}, {pipeline_mode = #tpu.pipeline_mode<synchronous>, transform_indices = @transform_3, window_bounds = array<i64: 1, 32>}, {pipeline_mode = #tpu.pipeline_mode<synchronous>, transform_indices = @transform_4, window_bounds = array<i64: 1, 32>}, {transform_indices = @transform_5, window_bounds = array<i64: 16, 128>}]} {
    %c0 = arith.constant 0 : index
    %c0_0 = arith.constant 0 : index
    %0 = vector.load %arg1[%c0, %c0_0] : memref<16x32xf32, #tpu.memory_space<vmem>>, vector<16x32xf32>
    %cst = arith.constant dense<0.000000e+00> : vector<16xf32>
    %1 = vector.multi_reduction <add>, %0, %cst [1] : vector<16x32xf32> to vector<16xf32>
    %2 = vector.shape_cast %1 : vector<16xf32> to vector<16x1xf32>
    %cst_1 = arith.constant 3.200000e+01 : f32
    %3 = vector.broadcast %cst_1 : f32 to vector<16x1xf32>
    %4 = arith.divf %2, %3 : vector<16x1xf32>
    %5 = vector.broadcast %4 : vector<16x1xf32> to vector<16x32xf32>
    %6 = arith.subf %0, %5 : vector<16x32xf32>
    %7 = arith.mulf %6, %6 : vector<16x32xf32>
    %cst_2 = arith.constant dense<0.000000e+00> : vector<16xf32>
    %8 = vector.multi_reduction <add>, %7, %cst_2 [1] : vector<16x32xf32> to vector<16xf32>
    %9 = vector.shape_cast %8 : vector<16xf32> to vector<16x1xf32>
    %cst_3 = arith.constant 3.200000e+01 : f32
    %10 = vector.broadcast %cst_3 : f32 to vector<16x1xf32>
    %11 = arith.divf %9, %10 : vector<16x1xf32>
    %cst_4 = arith.constant 9.99999974E-6 : f32
    %12 = vector.broadcast %cst_4 : f32 to vector<16x1xf32>
    %13 = arith.addf %11, %12 : vector<16x1xf32>
    %14 = math.rsqrt %13 : vector<16x1xf32>
    %15 = vector.broadcast %14 : vector<16x1xf32> to vector<16x32xf32>
    %16 = arith.mulf %6, %15 : vector<16x32xf32>
    %c0_5 = arith.constant 0 : index
    %c0_6 = arith.constant 0 : index
    %17 = vector.load %arg4[%c0_5, %c0_6] : memref<1x32xf32, #tpu.memory_space<vmem>>, vector<1x32xf32>
    %18 = vector.broadcast %17 : vector<1x32xf32> to vector<16x32xf32>
    %19 = arith.mulf %16, %18 : vector<16x32xf32>
    %c0_7 = arith.constant 0 : index
    %c0_8 = arith.constant 0 : index
    %20 = vector.load %arg5[%c0_7, %c0_8] : memref<1x32xf32, #tpu.memory_space<vmem>>, vector<1x32xf32>
    %21 = vector.broadcast %20 : vector<1x32xf32> to vector<16x32xf32>
    %22 = arith.addf %19, %21 : vector<16x32xf32>
    %23 = arith.truncf %22 : vector<16x32xf32> to vector<16x32xbf16>
    %c0_9 = arith.constant 0 : index
    %c0_10 = arith.constant 0 : index
    %24 = vector.load %arg2[%c0_9, %c0_10] : memref<32x128xbf16, #tpu.memory_space<vmem>>, vector<32x128xbf16>
    %cst_11 = arith.constant dense<0.000000e+00> : vector<16x128xf32>
    %25 = tpu.matmul %23, %24, %cst_11 {dimension_numbers = #tpu.dot_dimension_numbers<[1], [0], [0], [1], [0, 0, 1, 1], [], []>} : vector<16x32xbf16>, vector<32x128xbf16>, vector<16x128xf32> -> vector<16x128xf32>
    %c0_12 = arith.constant 0 : index
    %c0_13 = arith.constant 0 : index
    %26 = vector.load %arg3[%c0_12, %c0_13] : memref<1x128xf32, #tpu.memory_space<vmem>>, vector<1x128xf32>
    %27 = vector.broadcast %26 : vector<1x128xf32> to vector<16x128xf32>
    %28 = arith.addf %25, %27 : vector<16x128xf32>
    %cst_14 = arith.constant 1.702000e+00 : f32
    %29 = vector.broadcast %cst_14 : f32 to vector<16x128xf32>
    %30 = arith.mulf %29, %28 : vector<16x128xf32>
    %31 = arith.negf %30 : vector<16x128xf32>
    %32 = math.exp %31 : vector<16x128xf32>
    %cst_15 = arith.constant 1.000000e+00 : f32
    %33 = vector.broadcast %cst_15 : f32 to vector<16x128xf32>
    %34 = arith.addf %33, %32 : vector<16x128xf32>
    %35 = arith.divf %33, %34 : vector<16x128xf32>
    %36 = arith.mulf %28, %35 : vector<16x128xf32>
    %37 = arith.truncf %36 : vector<16x128xf32> to vector<16x128xbf16>
    %c0_16 = arith.constant 0 : index
    %c0_17 = arith.constant 0 : index
    %38 = vector.load %arg6[%c0_16, %c0_17] : memref<16x128xbf16, #tpu.memory_space<vmem>>, vector<16x128xbf16>
    tpu.vector_store %arg6[%c0_16, %c0_17], %37 {strides = array<i32>} : memref<16x128xbf16, #tpu.memory_space<vmem>>, vector<16x128xbf16>,
    return
  }
  func.func @transform_0(%arg0: i32) -> (i32, i32) {
    %c0_i32 = arith.constant 0 : i32
    %c0_i32_0 = arith.constant 0 : i32
    return %arg0, %c0_i32 : i32, i32
  }
  func.func @transform_1(%arg0: i32) -> (i32, i32) {
    %c0_i32 = arith.constant 0 : i32
    %c0_i32_0 = arith.constant 0 : i32
    %c0_i32_1 = arith.constant 0 : i32
    return %c0_i32, %c0_i32_0 : i32, i32
  }
  func.func @transform_2(%arg0: i32) -> (i32, i32) {
    %c0_i32 = arith.constant 0 : i32
    %c0_i32_0 = arith.constant 0 : i32
    %c0_i32_1 = arith.constant 0 : i32
    return %c0_i32, %c0_i32_0 : i32, i32
  }
  func.func @transform_3(%arg0: i32) -> (i32, i32) {
    %c0_i32 = arith.constant 0 : i32
    %c0_i32_0 = arith.constant 0 : i32
    %c0_i32_1 = arith.constant 0 : i32
    return %c0_i32, %c0_i32_0 : i32, i32
  }
  func.func @transform_4(%arg0: i32) -> (i32, i32) {
    %c0_i32 = arith.constant 0 : i32
    %c0_i32_0 = arith.constant 0 : i32
    %c0_i32_1 = arith.constant 0 : i32
    return %c0_i32, %c0_i32_0 : i32, i32
  }
  func.func @transform_5(%arg0: i32) -> (i32, i32) {
    %c0_i32 = arith.constant 0 : i32
    %c0_i32_0 = arith.constant 0 : i32
    return %arg0, %c0_i32 : i32, i32
  }
}

module attributes {stable_mosaic.version = 11 : i64} {
  func.func @_linear_kernel(%arg0: i32, %arg1: memref<16x128xbf16, #tpu.memory_space<vmem>>, %arg2: memref<128x32xbf16, #tpu.memory_space<vmem>>, %arg3: memref<1x32xf32, #tpu.memory_space<vmem>>, %arg4: memref<16x32xf32, #tpu.memory_space<vmem>>, %arg5: memref<16x32xf32, #tpu.memory_space<vmem>>) attributes {dimension_semantics = [#tpu.dimension_semantics<parallel>], iteration_bounds = array<i64: 1>, scalar_prefetch = 0 : i64, scratch_operands = 0 : i64, tpu.core_type = #tpu.core_type<tc>, window_params = [{transform_indices = @transform_0, window_bounds = array<i64: 16, 128>}, {pipeline_mode = #tpu.pipeline_mode<synchronous>, transform_indices = @transform_1, window_bounds = array<i64: 128, 32>}, {pipeline_mode = #tpu.pipeline_mode<synchronous>, transform_indices = @transform_2, window_bounds = array<i64: 1, 32>}, {transform_indices = @transform_3, window_bounds = array<i64: 16, 32>}, {transform_indices = @transform_4, window_bounds = array<i64: 16, 32>}]} {
    %c0 = arith.constant 0 : index
    %c0_0 = arith.constant 0 : index
    %0 = vector.load %arg1[%c0, %c0_0] : memref<16x128xbf16, #tpu.memory_space<vmem>>, vector<16x128xbf16>
    %c0_1 = arith.constant 0 : index
    %c0_2 = arith.constant 0 : index
    %1 = vector.load %arg2[%c0_1, %c0_2] : memref<128x32xbf16, #tpu.memory_space<vmem>>, vector<128x32xbf16>
    %cst = arith.constant dense<0.000000e+00> : vector<16x32xf32>
    %2 = tpu.matmul %0, %1, %cst {dimension_numbers = #tpu.dot_dimension_numbers<[1], [0], [0], [1], [0, 0, 1, 1], [], []>} : vector<16x128xbf16>, vector<128x32xbf16>, vector<16x32xf32> -> vector<16x32xf32>
    %c0_3 = arith.constant 0 : index
    %c0_4 = arith.constant 0 : index
    %3 = vector.load %arg3[%c0_3, %c0_4] : memref<1x32xf32, #tpu.memory_space<vmem>>, vector<1x32xf32>
    %4 = vector.broadcast %3 : vector<1x32xf32> to vector<16x32xf32>
    %5 = arith.addf %2, %4 : vector<16x32xf32>
    %c0_5 = arith.constant 0 : index
    %c0_6 = arith.constant 0 : index
    %6 = vector.load %arg4[%c0_5, %c0_6] : memref<16x32xf32, #tpu.memory_space<vmem>>, vector<16x32xf32>
    %7 = arith.addf %5, %6 : vector<16x32xf32>
    %c0_7 = arith.constant 0 : index
    %c0_8 = arith.constant 0 : index
    %8 = vector.load %arg5[%c0_7, %c0_8] : memref<16x32xf32, #tpu.memory_space<vmem>>, vector<16x32xf32>
    tpu.vector_store %arg5[%c0_7, %c0_8], %7 {strides = array<i32>} : memref<16x32xf32, #tpu.memory_space<vmem>>, vector<16x32xf32>,
    return
  }
  func.func @transform_0(%arg0: i32) -> (i32, i32) {
    %c0_i32 = arith.constant 0 : i32
    %c0_i32_0 = arith.constant 0 : i32
    return %arg0, %c0_i32 : i32, i32
  }
  func.func @transform_1(%arg0: i32) -> (i32, i32) {
    %c0_i32 = arith.constant 0 : i32
    %c0_i32_0 = arith.constant 0 : i32
    %c0_i32_1 = arith.constant 0 : i32
    return %c0_i32, %c0_i32_0 : i32, i32
  }
  func.func @transform_2(%arg0: i32) -> (i32, i32) {
    %c0_i32 = arith.constant 0 : i32
    %c0_i32_0 = arith.constant 0 : i32
    %c0_i32_1 = arith.constant 0 : i32
    return %c0_i32, %c0_i32_0 : i32, i32
  }
  func.func @transform_3(%arg0: i32) -> (i32, i32) {
    %c0_i32 = arith.constant 0 : i32
    %c0_i32_0 = arith.constant 0 : i32
    return %arg0, %c0_i32 : i32, i32
  }
  func.func @transform_4(%arg0: i32) -> (i32, i32) {
    %c0_i32 = arith.constant 0 : i32
    %c0_i32_0 = arith.constant 0 : i32
    return %arg0, %c0_i32 : i32, i32
  }
}

module attributes {stable_mosaic.version = 11 : i64} {
  func.func @_linear_kernel(%arg0: i32, %arg1: memref<16x32xbf16, #tpu.memory_space<vmem>>, %arg2: memref<32x32xbf16, #tpu.memory_space<vmem>>, %arg3: memref<1x32xf32, #tpu.memory_space<vmem>>, %arg4: memref<16x32xf32, #tpu.memory_space<vmem>>, %arg5: memref<16x32xf32, #tpu.memory_space<vmem>>) attributes {dimension_semantics = [#tpu.dimension_semantics<parallel>], iteration_bounds = array<i64: 1>, scalar_prefetch = 0 : i64, scratch_operands = 0 : i64, tpu.core_type = #tpu.core_type<tc>, window_params = [{transform_indices = @transform_0, window_bounds = array<i64: 16, 32>}, {pipeline_mode = #tpu.pipeline_mode<synchronous>, transform_indices = @transform_1, window_bounds = array<i64: 32, 32>}, {pipeline_mode = #tpu.pipeline_mode<synchronous>, transform_indices = @transform_2, window_bounds = array<i64: 1, 32>}, {transform_indices = @transform_3, window_bounds = array<i64: 16, 32>}, {transform_indices = @transform_4, window_bounds = array<i64: 16, 32>}]} {
    %c0 = arith.constant 0 : index
    %c0_0 = arith.constant 0 : index
    %0 = vector.load %arg1[%c0, %c0_0] : memref<16x32xbf16, #tpu.memory_space<vmem>>, vector<16x32xbf16>
    %c0_1 = arith.constant 0 : index
    %c0_2 = arith.constant 0 : index
    %1 = vector.load %arg2[%c0_1, %c0_2] : memref<32x32xbf16, #tpu.memory_space<vmem>>, vector<32x32xbf16>
    %cst = arith.constant dense<0.000000e+00> : vector<16x32xf32>
    %2 = tpu.matmul %0, %1, %cst {dimension_numbers = #tpu.dot_dimension_numbers<[1], [0], [0], [1], [0, 0, 1, 1], [], []>} : vector<16x32xbf16>, vector<32x32xbf16>, vector<16x32xf32> -> vector<16x32xf32>
    %c0_3 = arith.constant 0 : index
    %c0_4 = arith.constant 0 : index
    %3 = vector.load %arg3[%c0_3, %c0_4] : memref<1x32xf32, #tpu.memory_space<vmem>>, vector<1x32xf32>
    %4 = vector.broadcast %3 : vector<1x32xf32> to vector<16x32xf32>
    %5 = arith.addf %2, %4 : vector<16x32xf32>
    %c0_5 = arith.constant 0 : index
    %c0_6 = arith.constant 0 : index
    %6 = vector.load %arg4[%c0_5, %c0_6] : memref<16x32xf32, #tpu.memory_space<vmem>>, vector<16x32xf32>
    %7 = arith.addf %5, %6 : vector<16x32xf32>
    %c0_7 = arith.constant 0 : index
    %c0_8 = arith.constant 0 : index
    %8 = vector.load %arg5[%c0_7, %c0_8] : memref<16x32xf32, #tpu.memory_space<vmem>>, vector<16x32xf32>
    tpu.vector_store %arg5[%c0_7, %c0_8], %7 {strides = array<i32>} : memref<16x32xf32, #tpu.memory_space<vmem>>, vector<16x32xf32>,
    return
  }
  func.func @transform_0(%arg0: i32) -> (i32, i32) {
    %c0_i32 = arith.constant 0 : i32
    %c0_i32_0 = arith.constant 0 : i32
    return %arg0, %c0_i32 : i32, i32
  }
  func.func @transform_1(%arg0: i32) -> (i32, i32) {
    %c0_i32 = arith.constant 0 : i32
    %c0_i32_0 = arith.constant 0 : i32
    %c0_i32_1 = arith.constant 0 : i32
    return %c0_i32, %c0_i32_0 : i32, i32
  }
  func.func @transform_2(%arg0: i32) -> (i32, i32) {
    %c0_i32 = arith.constant 0 : i32
    %c0_i32_0 = arith.constant 0 : i32
    %c0_i32_1 = arith.constant 0 : i32
    return %c0_i32, %c0_i32_0 : i32, i32
  }
  func.func @transform_3(%arg0: i32) -> (i32, i32) {
    %c0_i32 = arith.constant 0 : i32
    %c0_i32_0 = arith.constant 0 : i32
    return %arg0, %c0_i32 : i32, i32
  }
  func.func @transform_4(%arg0: i32) -> (i32, i32) {
    %c0_i32 = arith.constant 0 : i32
    %c0_i32_0 = arith.constant 0 : i32
    return %arg0, %c0_i32 : i32, i32
  }
}

module attributes {stable_mosaic.version = 11 : i64} {
  func.func @_linear_kernel(%arg0: i32, %arg1: memref<16x32xf32, #tpu.memory_space<vmem>>, %arg2: memref<32x128xbf16, #tpu.memory_space<vmem>>, %arg3: memref<1x128xf32, #tpu.memory_space<vmem>>, %arg4: memref<1x32xf32, #tpu.memory_space<vmem>>, %arg5: memref<1x32xf32, #tpu.memory_space<vmem>>, %arg6: memref<16x128xbf16, #tpu.memory_space<vmem>>) attributes {dimension_semantics = [#tpu.dimension_semantics<parallel>], iteration_bounds = array<i64: 1>, scalar_prefetch = 0 : i64, scratch_operands = 0 : i64, tpu.core_type = #tpu.core_type<tc>, window_params = [{transform_indices = @transform_0, window_bounds = array<i64: 16, 32>}, {pipeline_mode = #tpu.pipeline_mode<synchronous>, transform_indices = @transform_1, window_bounds = array<i64: 32, 128>}, {pipeline_mode = #tpu.pipeline_mode<synchronous>, transform_indices = @transform_2, window_bounds = array<i64: 1, 128>}, {pipeline_mode = #tpu.pipeline_mode<synchronous>, transform_indices = @transform_3, window_bounds = array<i64: 1, 32>}, {pipeline_mode = #tpu.pipeline_mode<synchronous>, transform_indices = @transform_4, window_bounds = array<i64: 1, 32>}, {transform_indices = @transform_5, window_bounds = array<i64: 16, 128>}]} {
    %c0 = arith.constant 0 : index
    %c0_0 = arith.constant 0 : index
    %0 = vector.load %arg1[%c0, %c0_0] : memref<16x32xf32, #tpu.memory_space<vmem>>, vector<16x32xf32>
    %cst = arith.constant dense<0.000000e+00> : vector<16xf32>
    %1 = vector.multi_reduction <add>, %0, %cst [1] : vector<16x32xf32> to vector<16xf32>
    %2 = vector.shape_cast %1 : vector<16xf32> to vector<16x1xf32>
    %cst_1 = arith.constant 3.200000e+01 : f32
    %3 = vector.broadcast %cst_1 : f32 to vector<16x1xf32>
    %4 = arith.divf %2, %3 : vector<16x1xf32>
    %5 = vector.broadcast %4 : vector<16x1xf32> to vector<16x32xf32>
    %6 = arith.subf %0, %5 : vector<16x32xf32>
    %7 = arith.mulf %6, %6 : vector<16x32xf32>
    %cst_2 = arith.constant dense<0.000000e+00> : vector<16xf32>
    %8 = vector.multi_reduction <add>, %7, %cst_2 [1] : vector<16x32xf32> to vector<16xf32>
    %9 = vector.shape_cast %8 : vector<16xf32> to vector<16x1xf32>
    %cst_3 = arith.constant 3.200000e+01 : f32
    %10 = vector.broadcast %cst_3 : f32 to vector<16x1xf32>
    %11 = arith.divf %9, %10 : vector<16x1xf32>
    %cst_4 = arith.constant 9.99999974E-6 : f32
    %12 = vector.broadcast %cst_4 : f32 to vector<16x1xf32>
    %13 = arith.addf %11, %12 : vector<16x1xf32>
    %14 = math.rsqrt %13 : vector<16x1xf32>
    %15 = vector.broadcast %14 : vector<16x1xf32> to vector<16x32xf32>
    %16 = arith.mulf %6, %15 : vector<16x32xf32>
    %c0_5 = arith.constant 0 : index
    %c0_6 = arith.constant 0 : index
    %17 = vector.load %arg4[%c0_5, %c0_6] : memref<1x32xf32, #tpu.memory_space<vmem>>, vector<1x32xf32>
    %18 = vector.broadcast %17 : vector<1x32xf32> to vector<16x32xf32>
    %19 = arith.mulf %16, %18 : vector<16x32xf32>
    %c0_7 = arith.constant 0 : index
    %c0_8 = arith.constant 0 : index
    %20 = vector.load %arg5[%c0_7, %c0_8] : memref<1x32xf32, #tpu.memory_space<vmem>>, vector<1x32xf32>
    %21 = vector.broadcast %20 : vector<1x32xf32> to vector<16x32xf32>
    %22 = arith.addf %19, %21 : vector<16x32xf32>
    %23 = arith.truncf %22 : vector<16x32xf32> to vector<16x32xbf16>
    %c0_9 = arith.constant 0 : index
    %c0_10 = arith.constant 0 : index
    %24 = vector.load %arg2[%c0_9, %c0_10] : memref<32x128xbf16, #tpu.memory_space<vmem>>, vector<32x128xbf16>
    %cst_11 = arith.constant dense<0.000000e+00> : vector<16x128xf32>
    %25 = tpu.matmul %23, %24, %cst_11 {dimension_numbers = #tpu.dot_dimension_numbers<[1], [0], [0], [1], [0, 0, 1, 1], [], []>} : vector<16x32xbf16>, vector<32x128xbf16>, vector<16x128xf32> -> vector<16x128xf32>
    %c0_12 = arith.constant 0 : index
    %c0_13 = arith.constant 0 : index
    %26 = vector.load %arg3[%c0_12, %c0_13] : memref<1x128xf32, #tpu.memory_space<vmem>>, vector<1x128xf32>
    %27 = vector.broadcast %26 : vector<1x128xf32> to vector<16x128xf32>
    %28 = arith.addf %25, %27 : vector<16x128xf32>
    %cst_14 = arith.constant 1.702000e+00 : f32
    %29 = vector.broadcast %cst_14 : f32 to vector<16x128xf32>
    %30 = arith.mulf %29, %28 : vector<16x128xf32>
    %31 = arith.negf %30 : vector<16x128xf32>
    %32 = math.exp %31 : vector<16x128xf32>
    %cst_15 = arith.constant 1.000000e+00 : f32
    %33 = vector.broadcast %cst_15 : f32 to vector<16x128xf32>
    %34 = arith.addf %33, %32 : vector<16x128xf32>
    %35 = arith.divf %33, %34 : vector<16x128xf32>
    %36 = arith.mulf %28, %35 : vector<16x128xf32>
    %37 = arith.truncf %36 : vector<16x128xf32> to vector<16x128xbf16>
    %c0_16 = arith.constant 0 : index
    %c0_17 = arith.constant 0 : index
    %38 = vector.load %arg6[%c0_16, %c0_17] : memref<16x128xbf16, #tpu.memory_space<vmem>>, vector<16x128xbf16>
    tpu.vector_store %arg6[%c0_16, %c0_17], %37 {strides = array<i32>} : memref<16x128xbf16, #tpu.memory_space<vmem>>, vector<16x128xbf16>,
    return
  }
  func.func @transform_0(%arg0: i32) -> (i32, i32) {
    %c0_i32 = arith.constant 0 : i32
    %c0_i32_0 = arith.constant 0 : i32
    return %arg0, %c0_i32 : i32, i32
  }
  func.func @transform_1(%arg0: i32) -> (i32, i32) {
    %c0_i32 = arith.constant 0 : i32
    %c0_i32_0 = arith.constant 0 : i32
    %c0_i32_1 = arith.constant 0 : i32
    return %c0_i32, %c0_i32_0 : i32, i32
  }
  func.func @transform_2(%arg0: i32) -> (i32, i32) {
    %c0_i32 = arith.constant 0 : i32
    %c0_i32_0 = arith.constant 0 : i32
    %c0_i32_1 = arith.constant 0 : i32
    return %c0_i32, %c0_i32_0 : i32, i32
  }
  func.func @transform_3(%arg0: i32) -> (i32, i32) {
    %c0_i32 = arith.constant 0 : i32
    %c0_i32_0 = arith.constant 0 : i32
    %c0_i32_1 = arith.constant 0 : i32
    return %c0_i32, %c0_i32_0 : i32, i32
  }
  func.func @transform_4(%arg0: i32) -> (i32, i32) {
    %c0_i32 = arith.constant 0 : i32
    %c0_i32_0 = arith.constant 0 : i32
    %c0_i32_1 = arith.constant 0 : i32
    return %c0_i32, %c0_i32_0 : i32, i32
  }
  func.func @transform_5(%arg0: i32) -> (i32, i32) {
    %c0_i32 = arith.constant 0 : i32
    %c0_i32_0 = arith.constant 0 : i32
    return %arg0, %c0_i32 : i32, i32
  }
}

</mosaic_0001>

<bundles_post_ra>
// kernel: transformer_forward.10
= control target key start
LH: loop header
LB: loop body
LE: loop exit
PB: predicated region body
PF: predicated region fallthrough
CT: control target
= control target key end

     0   :  { %vm23_vm0 = vcmask 261120   ;;  %v155_v4 = vmov 32.0   ;;  %vm127_vm8 = vcmask 781312   ;;  %s218_s0 = inlined_call_operand.vmem [shape: f32[16,32], index: 0, kind: input, shape index: {}]   ;;  %s219_s3 = inlined_call_operand.vmem [shape: f32[1,32], index: 3, kind: input, shape index: {}]   ;;  %s220_s4 = inlined_call_operand.vmem [shape: f32[1,32], index: 4, kind: input, shape index: {}]   ;;  %s221_s2 = inlined_call_operand.vmem [shape: f32[1,96], index: 2, kind: input, shape index: {}]   ;;  %s222_s1 = inlined_call_operand.vmem [shape: bf16[32,96], index: 1, kind: input, shape index: {}]   ;;  %s223_s5 = inlined_call_operand.vmem [shape: bf16[16,96], index: 5, kind: output, shape index: {}]  }
   0x1   :  { %v21_v0 = vld [vmem:[%s218_s0] sm:$0xff]  ;;  %v22_v2 = vld [vmem:[%s218_s0 + $0x8] sm:$0xff]  ;;  %149 = vrcp.f32 %v155_v4 }
   0x2   :  { %v24_v1 = vsel %vm23_vm0, %v21_v0, 0.0  ;;  %v27_v3 = vsel %vm23_vm0, %v22_v2, 0.0  ;;  %v144_v21 = vld [vmem:[%s222_s1 + $0x8] sm:$0xff]  ;;  %v143_v23 = vld [vmem:[%s222_s1] sm:$0xff] }
   0x3   :  { %25 = vadd.xlane.f32.xlu0 %v24_v1  ;;  %117 = vmatpush.bf16.msra.mxu0 %v144_v21  ;;  %v146_v42 = vld [vmem:[%s219_s3] ss:$0 sm:$0xff] }
   0x4   :  { %v147_v47 = vld [vmem:[%s220_s4] ss:$0 sm:$0xff] }
   0x5   :  { %v148_v52 = vld [vmem:[%s221_s2] ss:$0 sm:$0xff] }
   0x7   :  { %v150_v5 = vpop.eup %149  ;;  %118 = vmatpush.bf16.msra.mxu0 %v143_v23 }
   0x8   :  { %v31_v6 = vmul.f32 32.0, %v150_v5  ;;  %vm35_vm1 = vweird.f32 %v150_v5 }
   0xa   :  { %v32_v7 = vsub.f32 1.0, %v31_v6 }
   0xb   :  { %28 = vadd.xlane.f32.xlu0 %v27_v3 }
   0xc   :  { %v33_v8 = vmul.f32 %v150_v5, %v32_v7 }
   0xe   :  { %v34_v9 = vadd.f32 %v150_v5, %v33_v8 }
  0x10   :  { %v36_v10 = vsel %vm35_vm1, %v150_v5, %v34_v9 }
  0x76   :  { %v26_v11 = vpop.xlane.xlu0 %25 }
  0x77   :  { %v37_v12 = vmul.f32 %v36_v10, %v26_v11 }
  0x79   :  { %v39_v13 = vsub.f32 %v21_v0, %v37_v12 }
  0x7b   :  { %v41_v14 = vmul.f32 %v39_v13, %v39_v13 }
  0x7d   :  { %v43_v15 = vsel %vm23_vm0, %v41_v14, 0.0 }
  0x7e   :  { %44 = vadd.xlane.f32.xlu1 %v43_v15  ;;  %v29_v16 = vpop.xlane.xlu0 %28 }
  0x7f   :  { %v38_v17 = vmul.f32 %v36_v10, %v29_v16 }
  0x81   :  { %v40_v18 = vsub.f32 %v22_v2, %v38_v17 }
  0x83   :  { %v42_v19 = vmul.f32 %v40_v18, %v40_v18 }
  0x85   :  { %v46_v20 = vsel %vm23_vm0, %v42_v19, 0.0 }
  0x86   :  { %47 = vadd.xlane.f32.xlu1 %v46_v20 }
  0xf1   :  { %v45_v22 = vpop.xlane.xlu1 %44 }
  0xf2   :  { %v49_v24 = vmul.f32 %v45_v22, %v36_v10 }
  0xf4   :  { %v51_v25 = vadd.f32 1e-05, %v49_v24 }
  0xf6   :  { %151 = vrsqrt.f32 %v51_v25  ;;  %vm59_vm3 = vweird.f32 %v51_v25 }
  0xf9   :  { %v48_v26 = vpop.xlane.xlu1 %47 }
  0xfa   :  { %v50_v27 = vmul.f32 %v48_v26, %v36_v10 }
  0xfc   :  { %v152_v28 = vpop.eup %151  ;;  %v52_v29 = vadd.f32 1e-05, %v50_v27 }
  0xfd   :  { %v54_v30 = vmul.f32 %v152_v28, %v51_v25  ;;  %vm60_vm2 = vweird.f32 %v152_v28 }
  0xfe   :  { %153 = vrsqrt.f32 %v52_v29  ;;  %vm61_vm4 = vmor %vm59_vm3, %vm60_vm2  ;;  %vm69_vm6 = vweird.f32 %v52_v29 }
  0xff   :  { %v55_v31 = vmul.f32 %v152_v28, %v54_v30 }
 0x101   :  { %v56_v32 = vmul.f32 0.5, %v55_v31 }
 0x103   :  { %v57_v33 = vsub.f32 1.5, %v56_v32 }
 0x104   :  { %v154_v34 = vpop.eup %153 }
 0x105   :  { %v58_v35 = vmul.f32 %v152_v28, %v57_v33  ;;  %v64_v36 = vmul.f32 %v154_v34, %v52_v29  ;;  %vm70_vm5 = vweird.f32 %v154_v34 }
 0x106   :  { %vm71_vm7 = vmor %vm69_vm6, %vm70_vm5 }
 0x107   :  { %v65_v37 = vmul.f32 %v154_v34, %v64_v36  ;;  %v62_v38 = vsel %vm61_vm4, %v152_v28, %v58_v35 }
 0x108   :  { %v73_v41 = vmul.f32 %v62_v38, %v39_v13 }
 0x109   :  { %v66_v39 = vmul.f32 0.5, %v65_v37 }
 0x10a   :  { %v79_v46 = vmul.f32 %v146_v42, %v73_v41 }
 0x10b   :  { %v67_v40 = vsub.f32 1.5, %v66_v39 }
 0x10c   :  { %v85_v49 = vadd.f32 %v147_v47, %v79_v46 }
 0x10d   :  { %v68_v43 = vmul.f32 %v154_v34, %v67_v40 }
 0x10f   :  { %v72_v44 = vsel %vm71_vm7, %v154_v34, %v68_v43 }
 0x110   :  { %v74_v45 = vmul.f32 %v72_v44, %v40_v18 }
 0x112   :  { %v80_v48 = vmul.f32 %v146_v42, %v74_v45 }
 0x114   :  { %v86_v50 = vadd.f32 %v147_v47, %v80_v48 }
 0x116   :  { %v87_v51 = vpack.c.bf16 %v86_v50, %v85_v49 }
 0x118   :  { %142 = vmatmul.msk.bf16.vlgmr.msra.gmra.mxu0 %vm23_vm0, %v87_v51 }
 0x195   :  { %v120_v53 = vpop.f32.mrf.mxu0 }
 0x196   :  { %v121_v54 = vadd.f32 %v148_v52, %v120_v53 }
 0x198   :  { %v125_v55 = vpack.c.bf16 %v121_v54, %v121_v54 }
 0x19a   :  { %128 = vst.msk [vmem:[%s223_s5] sm:$0xf] %vm127_vm8, %v125_v55 }
 0x19d   :  { %v122_v56 = vpop.f32.mrf.mxu0 }
 0x19e   :  { %v123_v57 = vadd.f32 %v148_v52, %v122_v56 }
 0x1a0   :  { %v126_v58 = vpack.c.bf16 %v123_v57, %v123_v57 }
 0x1a2   :  { %129 = vst.msk [vmem:[%s223_s5 + $0x4] sm:$0xf] %vm127_vm8, %v126_v58 }

// kernel: transformer_forward.12
= control target key start
LH: loop header
LB: loop body
LE: loop exit
PB: predicated region body
PF: predicated region fallthrough
CT: control target
= control target key end

     0   :  { %9 = vsyncpa [#allocation3], 0  ;;  %s136_s18 = smov [#allocation2]   ;;  %s137_s20 = smov 64   ;;  %s185_s0 = inlined_call_operand.vmem [shape: bf16[16,32], index: 0, kind: input, shape index: {}]   ;;  %s186_s1 = inlined_call_operand.hbm [shape: bf16[32,32], index: 1, kind: input, shape index: {}]   ;;  %s187_s2 = inlined_call_operand.vmem [shape: f32[1,32], index: 2, kind: input, shape index: {}]   ;;  %s188_s3 = inlined_call_operand.vmem [shape: f32[16,32], index: 3, kind: input, shape index: {}]   ;;  %s189_s4 = inlined_call_operand.vmem [shape: f32[16,32], index: 4, kind: output, shape index: {}]  }
   0x1   :  { %s16_s17 = sshll.u32 %s186_s1, 4  ;;  %s18_s19 = sshll.u32 %s136_s18, 4  ;;  %s17_s17 = int_to_ptr.hbm [resolvable:$true] %s16_s17  ;;  %s19_s19 = int_to_ptr.vmem [resolvable:$true] %s18_s19 }
   0x2   :  { %s138_s21 = smov 4  }
   0x3   :  { %24 = dma.hbm_to_vmem [thread:$0]  %s17_s17, 256, %s19_s19, [#allocation3], %s137_s20, %s137_s20, %s138_s21  }
   0x4   :  { %134 = dma.done.wait [#allocation3], 256  }
   0x5   :  { %135 = vsyncadd [#allocation3], 4294967040  ;;  %v105_v0 = vld [vmem:[#allocation2 + $0x8] sm:$0xff]  ;;  %v104_v1 = vld [vmem:[#allocation2] sm:$0xff]  ;;  %vm61_vm0 = vcmask 261120  }
   0x6   :  { %71 = vmatpush.bf16.msra.mxu0 %v105_v0  ;;  %v103_v2 = vld [vmem:[%s185_s0] sm:$0xff]  ;;  %v80_v9 = vld [vmem:[%s188_s3 + $0x8] sm:$0xff] }
   0x7   :  { %v109_v3 = vld [vmem:[%s187_s2] ss:$0 sm:$0xff] }
   0x8   :  { %v79_v5 = vld [vmem:[%s188_s3] sm:$0xff] }
   0xa   :  { %72 = vmatpush.bf16.msra.mxu0 %v104_v1 }
   0xd   :  { %102 = vmatmul.msk.bf16.vlgmr.msra.gmra.mxu0 %vm61_vm0, %v103_v2 }
  0x8a   :  { %v74_v4 = vpop.f32.mrf.mxu0 }
  0x8b   :  { %v75_v6 = vadd.f32 %v109_v3, %v74_v4 }
  0x8d   :  { %v81_v7 = vadd.f32 %v79_v5, %v75_v6 }
  0x8f   :  { %83 = vst.msk [vmem:[%s189_s4] sm:$0xff] %vm61_vm0, %v81_v7 }
  0x92   :  { %v76_v8 = vpop.f32.mrf.mxu0 }
  0x93   :  { %v77_v10 = vadd.f32 %v109_v3, %v76_v8 }
  0x95   :  { %v82_v11 = vadd.f32 %v80_v9, %v77_v10 }
  0x97   :  { %84 = vst.msk [vmem:[%s189_s4 + $0x8] sm:$0xff] %vm61_vm0, %v82_v11 }
  0x98   :  { %89 = vsyncpa [#allocation3], 1 }

// kernel: transformer_forward.11
= control target key start
LH: loop header
LB: loop body
LE: loop exit
PB: predicated region body
PF: predicated region fallthrough
CT: control target
= control target key end

     0   :  { %s511_s6 = smov 0   ;;  %s569_s0 = inlined_call_operand.vmem [shape: bf16[2,8,96], index: 0, kind: input, shape index: {}]   ;;  %s570_s1 = inlined_call_operand.vmem [shape: bf16[2,8,32], index: 1, kind: output, shape index: {}]  }
   0x1 LB: > { %s424_s7 = sadd.s32 4294967295, %s485_s6   ;;  %p428_p0 = scmp.ge.s32.totalorder %s485_s6, 1  ;;  %s485_s6 = sphi %s511_s6, %s11_s6  }
   0x2   : > { %p86_p1 = scmp.lt.s32.totalorder %s485_s6, 3 }
   0x4   : > { %p87_p2 = pnand %p428_p0, %p86_p1 }
   0x5   : > { %p104_p3 = scmp.lt.s32.totalorder (!%p87_p2), %s424_s7, 1  ;;  %s487_s12 = smov (!%p87_p2), 96  }
   0x6   : > { %90 = sbr.rel (%p87_p2) target bundleno = 923 (0x39b), region = 24  ;;  %s488_s13 = smov (!%p87_p2), 88  }
   0x7   : > { %s489_s14 = smov (!%p87_p2), 120   ;;  %s490_s15 = smov (!%p87_p2), 72  }
   0x8   : > { %s491_s16 = smov (!%p87_p2), 104   ;;  %s492_s17 = smov (!%p87_p2), 64  }
   0x9   : > { %s493_s18 = smov (!%p87_p2), 80   ;;  %s494_s19 = smov (!%p87_p2), 112  }
   0xa   : > { %s495_s20 = smov (!%p87_p2), 56   ;;  %s496_s21 = smov (!%p87_p2), 40  }
   0xb   : > { %s572_s7 = smov (!%p104_p3, %s424_s7), 1  ;;  %vm122_vm0 = vcmask 64512   ;;  %vm157_vm1 = vcmask 1043456   ;;  %s497_s22 = smov 48   ;;  %vm177_vm2 = vcmask 60416   ;;  %vm243_vm3 = vcmask 126016  }
   0xc   : > { %s429_s8 = sshll.u32 %s572_s7, 2  ;;  %s498_s23 = smov 8   ;;  %vm306_vm4 = vcmask 191616   ;;  %vm369_vm5 = vcmask 257216  }
   0xd   : > { %s107_s11 = scalar_lea.vmem %s569_s0, %s429_s8  ;;  %s499_s24 = smov 24  }
   0xe   : > { %v113_v0 = vld [vmem:[%s107_s11] sm:$0xf]  ;;  %s111_s27 = scalar_lea.vmem %s570_s1, %s429_s8  ;;  %s500_s28 = smov 16  }
   0xf   : > { %v118_v1 = vunpack.c.l.b16 %v113_v0  ;;  %v114_v3 = vunpack.c.l.bf16 %v113_v0 }
  0x11   : > { %v527_v2 = vpack.c.b16 %v118_v1, %v118_v1  ;;  %v115_v4 = vmul.f32 0.35355338, %v114_v3 }
  0x13   : > { %120 = vrot.lane.b32.xlu0 %v527_v2, %s487_s12  ;;  %184 = vrot.lane.b32.xlu1 %v527_v2, %s488_s13  ;;  %v116_v5 = vpack.c.bf16 %v115_v4, %v115_v4 }
  0x14   : > { %152 = vrot.lane.b32.xlu2 %v527_v2, %s492_s17 }
  0x15   : > { %v180_v6 = vunpack.c.l.b16 %v116_v5 }
  0x17   : > { %v181_v7 = vpack.c.b16 %v180_v6, %v180_v6 }
  0x1b   : > { %182 = vrot.lane.b32.xlu1 %v181_v7, %s489_s14 }
  0x1c   : > { %247 = vrot.lane.b32.xlu2 %v527_v2, %s493_s18 }
  0x23   : > { %310 = vrot.lane.b32.xlu1 %v527_v2, %s490_s15 }
  0x24   : > { %245 = vrot.lane.b32.xlu2 %v181_v7, %s494_s19 }
  0x2b   : > { %308 = vrot.lane.b32.xlu1 %v181_v7, %s491_s16 }
  0x33   : > { %215 = vrot.lane.b32.xlu1 %v527_v2, %s495_s20 }
  0x6e   : > { %v153_v20 = vpop.permute.xlu2 %152 }
  0x6f   : > { %v159_v22 = vsel %vm157_vm1, %v153_v20, 0 }
  0x70   : > { %168 = vmatpush.bf16.msra.mxu1 %v159_v22 }
  0x76   : > { %v248_v23 = vpop.permute.xlu2 %247 }
  0x77   : > { %v253_v25 = vsel %vm122_vm0, %v248_v23, 0 }
  0x78   : > { %262 = vmatpush.bf16.xpose.msrb.mxu1 %v253_v25 }
  0x7e   : > { %v246_v34 = vpop.permute.xlu2 %245 }
  0x85   : > { %v121_v8 = vpop.permute.xlu0 %120  ;;  %v185_v9 = vpop.permute.xlu1 %184 }
  0x86   : > { %v127_v10 = vsel %vm122_vm0, %v121_v8, 0  ;;  %v190_v11 = vsel %vm122_vm0, %v185_v9, 0 }
  0x87   : > { %136 = vmatpush.bf16.xpose.msra.mxu0 %v127_v10  ;;  %199 = vmatpush.bf16.xpose.msra.mxu2 %v190_v11 }
  0x8d   : > { %v183_v12 = vpop.permute.xlu1 %182 }
  0x8e   : > { %431 = vmatmul.msk.bf16.vlgmr.msra.gmra.mxu0 %vm122_vm0, %v116_v5  ;;  %433 = vmatmul.msk.bf16.vlgmr.msra.gmra.mxu2 %vm122_vm0, %v183_v12 }
  0x95   : > { %v311_v13 = vpop.permute.xlu1 %310 }
  0x96   : > { %v316_v14 = vsel %vm122_vm0, %v311_v13, 0 }
  0x97   : > { %325 = vmatpush.bf16.xpose.msrb.mxu0 %v316_v14 }
  0x9d   : > { %v309_v15 = vpop.permute.xlu1 %308 }
  0x9e   : > { %437 = vmatmul.msk.bf16.vlgmr.msrb.gmra.mxu0 %vm122_vm0, %v309_v15 }
  0xa5   : > { %v216_v35 = vpop.permute.xlu1 %215 }
  0xa6   : > { %v221_v36 = vsel %vm157_vm1, %v216_v35, 0 }
  0xa7   : > { %230 = vmatpush.bf16.msra.mxu3 %v221_v36 }
 0x10b   : > { %v138_v16 = vpop.f32.mrf.mxu0 }
 0x10c   : > { %v142_v17 = vsel %vm122_vm0, %v138_v16, -inf }
 0x10d   : > { %143 = vmax.xlane.f32.xlu0 %v142_v17 }
 0x111   : > { %v201_v19 = vpop.f32.mrf.mxu2 }
 0x112   : > { %v205_v21 = vsel %vm122_vm0, %v201_v19, -inf }
 0x113   : > { %v140_v18 = vpop.f32.mrf.mxu0  ;;  %206 = vmax.xlane.f32.xlu2 %v205_v21 }
 0x119   : > { %v203_v24 = vpop.f32.mrf.mxu2 }
 0x11b   : > { %v327_v26 = vpop.f32.mrf.mxu0 }
 0x11c   : > { %v331_v27 = vsel %vm122_vm0, %v327_v26, -inf }
 0x11d   : > { %332 = vmax.xlane.f32.xlu0 %v331_v27 }
 0x123   : > { %v329_v28 = vpop.f32.mrf.mxu0 }
 0x12b   : > { %341 = vrot.lane.b32.xlu2 %v527_v2, %s496_s21 }
 0x131   : > { %278 = vrot.lane.b32.xlu0 %v527_v2, %s497_s22 }
 0x180   : > { %v144_v29 = vpop.xlane.xlu0 %143 }
 0x181   : > { %v145_v30 = vsub.f32 %v138_v16, %v144_v29 }
 0x183   : > { %v146_v31 = vmul.f32 1.442695, %v145_v30 }
 0x185   : > { %463 = vpow2.f32 %v146_v31 }
 0x186   : > { %v207_v37 = vpop.xlane.xlu2 %206 }
 0x187   : > { %v208_v38 = vsub.f32 %v201_v19, %v207_v37 }
 0x189   : > { %v209_v39 = vmul.f32 1.442695, %v208_v38 }
 0x18b   : > { %v464_v32 = vpop.eup %463  ;;  %465 = vpow2.f32 %v209_v39 }
 0x18c   : > { %v151_v33 = vpack.c.bf16 %v464_v32, %v464_v32  ;;  %v148_v4 = vsel %vm122_vm0, %v464_v32, 0.0 }
 0x18e   : > { %432 = vmatmul.msk.bf16.vlgmr.msra.gmra.mxu1 %vm122_vm0, %v151_v33  ;;  %v342_v40 = vpop.permute.xlu2 %341 }
 0x18f   : > { %v347_v41 = vsel %vm157_vm1, %v342_v40, 0 }
 0x190   : > { %v333_v42 = vpop.xlane.xlu0 %332  ;;  %356 = vmatpush.bf16.msrb.mxu2 %v347_v41 }
 0x191   : > { %v466_v43 = vpop.eup %465  ;;  %v334_v44 = vsub.f32 %v327_v26, %v333_v42 }
 0x192   : > { %v214_v45 = vpack.c.bf16 %v466_v43, %v466_v43  ;;  %v211_v46 = vsel %vm122_vm0, %v466_v43, 0.0 }
 0x193   : > { %v335_v47 = vmul.f32 1.442695, %v334_v44  ;;  %212 = vadd.xlane.f32.xlu0 %v211_v46 }
 0x194   : > { %434 = vmatmul.msk.bf16.vlgmr.msra.gmra.mxu3 %vm122_vm0, %v214_v45 }
 0x195   : > { %467 = vpow2.f32 %v335_v47 }
 0x19b   : > { %v468_v48 = vpop.eup %467 }
 0x19c   : > { %v340_v49 = vpack.c.bf16 %v468_v48, %v468_v48  ;;  %v337_v50 = vsel %vm122_vm0, %v468_v48, 0.0 }
 0x19d   : > { %338 = vadd.xlane.f32.xlu2 %v337_v50 }
 0x19e   : > { %435 = vmatmul.msk.bf16.vlgmr.msrb.gmra.mxu1 %vm122_vm0, %v246_v34  ;;  %438 = vmatmul.msk.bf16.vlgmr.msrb.gmra.mxu2 %vm122_vm0, %v340_v49 }
 0x1a3   : > { %v279_v56 = vpop.permute.xlu0 %278 }
 0x1a4   : > { %v284_v57 = vsel %vm157_vm1, %v279_v56, 0 }
 0x1a5   : > { %293 = vmatpush.bf16.msrb.mxu3 %v284_v57 }
 0x206   : > { %v213_v5 = vpop.xlane.xlu0 %212 }
 0x20b   : > { %v170_v51 = vpop.f32.mrf.mxu1 }
 0x210   : > { %v339_v6 = vpop.xlane.xlu2 %338 }
 0x213   : > { %v172_v52 = vpop.f32.mrf.mxu1 }
 0x217   : > { %v232_v58 = vpop.f32.mrf.mxu3 }
 0x21b   : > { %v264_v53 = vpop.f32.mrf.mxu1 }
 0x21c   : > { %v268_v54 = vsel %vm122_vm0, %v264_v53, -inf }
 0x21d   : > { %269 = vmax.xlane.f32.xlu1 %v268_v54 }
 0x21f   : > { %v234_v59 = vpop.f32.mrf.mxu3 }
 0x221   : > { %v358_v60 = vpop.f32.mrf.mxu2 }
 0x223   : > { %v266_v55 = vpop.f32.mrf.mxu1 }
 0x229   : > { %v360_v61 = vpop.f32.mrf.mxu2 }
 0x290   : > { %v270_v62 = vpop.xlane.xlu1 %269 }
 0x291   : > { %v271_v63 = vsub.f32 %v264_v53, %v270_v62 }
 0x293   : > { %v272_v0 = vmul.f32 1.442695, %v271_v63 }
 0x295   : > { %469 = vpow2.f32 %v272_v0 }
 0x296   : > { %471 = vrcp.f32 %v213_v5 }
 0x297   : > { %473 = vrcp.f32 %v339_v6 }
 0x29b   : > { %v470_v1 = vpop.eup %469 }
 0x29c   : > { %v274_v2 = vsel %vm122_vm0, %v470_v1, 0.0  ;;  %v277_v3 = vpack.c.bf16 %v470_v1, %v470_v1  ;;  %v472_v7 = vpop.eup %471 }
 0x29d   : > { %275 = vadd.xlane.f32.xlu1 %v274_v2  ;;  %v237_v8 = vmul.f32 %v472_v7, %v232_v58  ;;  %v474_v10 = vpop.eup %473 }
 0x29e   : > { %436 = vmatmul.msk.bf16.vlgmr.msrb.gmra.mxu3 %vm122_vm0, %v277_v3  ;;  %v363_v11 = vmul.f32 %v474_v10, %v358_v60 }
 0x29f   : > { %v238_v9 = vpack.c.bf16 %v237_v8, %v237_v8 }
 0x2a0   : > { %v364_v12 = vpack.c.bf16 %v363_v11, %v363_v11 }
 0x2a5   : > { %149 = vadd.xlane.f32.xlu1 %v148_v4 }
 0x2be   : > { %240 = vrot.lane.b32.xlu1 %v238_v9, %s498_s23 }
 0x2c6   : > { %366 = vrot.lane.b32.xlu1 %v364_v12, %s499_s24 }
 0x310   : > { %v276_v13 = vpop.xlane.xlu1 %275 }
 0x318   : > { %v150_v14 = vpop.xlane.xlu1 %149 }
 0x319   : > { %475 = vrcp.f32 %v150_v14 }
 0x31a   : > { %477 = vrcp.f32 %v276_v13 }
 0x31f   : > { %v476_v15 = vpop.eup %475 }
 0x320   : > { %v175_v16 = vmul.f32 %v476_v15, %v170_v51  ;;  %v478_v17 = vpop.eup %477 }
 0x321   : > { %v295_v18 = vpop.f32.mrf.mxu3 }
 0x322   : > { %v176_v19 = vpack.c.bf16 %v175_v16, %v175_v16  ;;  %v300_v20 = vmul.f32 %v478_v17, %v295_v18 }
 0x324   : > { %v301_v21 = vpack.c.bf16 %v300_v20, %v300_v20  ;;  %178 = vst.msk [vmem:[%s111_s27] sm:$0xf] %vm177_vm2, %v176_v19 }
 0x326   : > { %303 = vrot.lane.b32.xlu0 %v301_v21, %s500_s28 }
 0x329   : > { %v297_v22 = vpop.f32.mrf.mxu3 }
 0x330   : > { %v241_v23 = vpop.permute.xlu1 %240 }
 0x331   : > { %244 = vst.msk [vmem:[%s111_s27] sm:$0xf] %vm243_vm3, %v241_v23 }
 0x338   : > { %v367_v25 = vpop.permute.xlu1 %366 }
 0x398   : > { %v304_v24 = vpop.permute.xlu0 %303 }
 0x399   : > { %307 = vst.msk [vmem:[%s111_s27] sm:$0xf] %vm306_vm4, %v304_v24 }
 0x39a   : > { %370 = vst.msk [vmem:[%s111_s27] sm:$0xf] %vm369_vm5, %v367_v25 }
 0x39b PF: > { %s11_s6 = sadd.s32 1, %s485_s6  }
 0x39c   : > { %p8_p4 = scmp.ge.s32.totalorder %s11_s6, 4  }
 0x39e   :  { %10 = sbr.rel (!%p8_p4) target bundleno = 1 (0x1), region = 54 }

// kernel: transformer_forward.13
= control target key start
LH: loop header
LB: loop body
LE: loop exit
PB: predicated region body
PF: predicated region fallthrough
CT: control target
= control target key end

     0   :  { %10 = vsyncpa [#allocation3], 0  ;;  %s257_s21 = smov [#allocation2]   ;;  %s258_s23 = smov 64   ;;  %s317_s0 = inlined_call_operand.vmem [shape: f32[16,32], index: 0, kind: input, shape index: {}]   ;;  %s318_s1 = inlined_call_operand.hbm [shape: bf16[32,128], index: 1, kind: input, shape index: {}]   ;;  %s319_s2 = inlined_call_operand.vmem [shape: f32[1,128], index: 2, kind: input, shape index: {}]   ;;  %s320_s3 = inlined_call_operand.vmem [shape: f32[1,32], index: 3, kind: input, shape index: {}]   ;;  %s321_s4 = inlined_call_operand.vmem [shape: f32[1,32], index: 4, kind: input, shape index: {}]   ;;  %s322_s5 = inlined_call_operand.vmem [shape: bf16[16,128], index: 5, kind: output, shape index: {}]  }
   0x1   :  { %s17_s20 = sshll.u32 %s318_s1, 4  ;;  %s19_s22 = sshll.u32 %s257_s21, 4  ;;  %s18_s20 = int_to_ptr.hbm [resolvable:$true] %s17_s20  ;;  %s20_s22 = int_to_ptr.vmem [resolvable:$true] %s19_s22 }
   0x2   :  { %s259_s24 = smov 4  }
   0x3   :  { %25 = dma.hbm_to_vmem [thread:$0]  %s18_s20, 256, %s20_s22, [#allocation3], %s258_s23, %s258_s23, %s259_s24  }
   0x4   :  { %255 = dma.done.wait [#allocation3], 256  }
   0x5   :  { %256 = vsyncadd [#allocation3], 4294967040  ;;  %vm39_vm0 = vcmask 261120   ;;  %v37_v0 = vld [vmem:[%s317_s0] sm:$0xff]  ;;  %v38_v2 = vld [vmem:[%s317_s0 + $0x8] sm:$0xff]  ;;  %v260_v4 = vmov 32.0  }
   0x6   :  { %v40_v1 = vsel %vm39_vm0, %v37_v0, 0.0  ;;  %v43_v3 = vsel %vm39_vm0, %v38_v2, 0.0  ;;  %217 = vrcp.f32 %v260_v4  ;;  %v204_v21 = vld [vmem:[#allocation2 + $0x8] sm:$0xff]  ;;  %v203_v23 = vld [vmem:[#allocation2] sm:$0xff] }
   0x7   :  { %41 = vadd.xlane.f32.xlu0 %v40_v1  ;;  %133 = vmatpush.bf16.msra.mxu0 %v204_v21  ;;  %v214_v42 = vld [vmem:[%s320_s3] ss:$0 sm:$0xff] }
   0x8   :  { %v215_v47 = vld [vmem:[%s321_s4] ss:$0 sm:$0xff] }
   0x9   :  { %v216_v52 = vld [vmem:[%s319_s2] ss:$0 sm:$0xff] }
   0xb   :  { %134 = vmatpush.bf16.msra.mxu0 %v203_v23 }
   0xc   :  { %v218_v5 = vpop.eup %217 }
   0xd   :  { %v47_v6 = vmul.f32 32.0, %v218_v5  ;;  %vm51_vm1 = vweird.f32 %v218_v5 }
   0xf   :  { %44 = vadd.xlane.f32.xlu0 %v43_v3  ;;  %v48_v7 = vsub.f32 1.0, %v47_v6 }
  0x11   :  { %v49_v8 = vmul.f32 %v218_v5, %v48_v7 }
  0x13   :  { %v50_v9 = vadd.f32 %v218_v5, %v49_v8 }
  0x15   :  { %v52_v10 = vsel %vm51_vm1, %v218_v5, %v50_v9 }
  0x7a   :  { %v42_v11 = vpop.xlane.xlu0 %41 }
  0x7b   :  { %v53_v12 = vmul.f32 %v52_v10, %v42_v11 }
  0x7d   :  { %v55_v13 = vsub.f32 %v37_v0, %v53_v12 }
  0x7f   :  { %v57_v14 = vmul.f32 %v55_v13, %v55_v13 }
  0x81   :  { %v59_v15 = vsel %vm39_vm0, %v57_v14, 0.0 }
  0x82   :  { %60 = vadd.xlane.f32.xlu1 %v59_v15  ;;  %v45_v16 = vpop.xlane.xlu0 %44 }
  0x83   :  { %v54_v17 = vmul.f32 %v52_v10, %v45_v16 }
  0x85   :  { %v56_v18 = vsub.f32 %v38_v2, %v54_v17 }
  0x87   :  { %v58_v19 = vmul.f32 %v56_v18, %v56_v18 }
  0x89   :  { %v62_v20 = vsel %vm39_vm0, %v58_v19, 0.0 }
  0x8a   :  { %63 = vadd.xlane.f32.xlu1 %v62_v20 }
  0xf5   :  { %v61_v22 = vpop.xlane.xlu1 %60 }
  0xf6   :  { %v65_v24 = vmul.f32 %v61_v22, %v52_v10 }
  0xf8   :  { %v67_v25 = vadd.f32 1e-05, %v65_v24 }
  0xfa   :  { %219 = vrsqrt.f32 %v67_v25  ;;  %vm75_vm3 = vweird.f32 %v67_v25 }
  0xfd   :  { %v64_v26 = vpop.xlane.xlu1 %63 }
  0xfe   :  { %v66_v27 = vmul.f32 %v64_v26, %v52_v10 }
 0x100   :  { %v220_v28 = vpop.eup %219  ;;  %v68_v29 = vadd.f32 1e-05, %v66_v27 }
 0x101   :  { %v70_v30 = vmul.f32 %v220_v28, %v67_v25  ;;  %vm76_vm2 = vweird.f32 %v220_v28 }
 0x102   :  { %221 = vrsqrt.f32 %v68_v29  ;;  %vm77_vm4 = vmor %vm75_vm3, %vm76_vm2  ;;  %vm85_vm6 = vweird.f32 %v68_v29 }
 0x103   :  { %v71_v31 = vmul.f32 %v220_v28, %v70_v30 }
 0x105   :  { %v72_v32 = vmul.f32 0.5, %v71_v31 }
 0x107   :  { %v73_v33 = vsub.f32 1.5, %v72_v32 }
 0x108   :  { %v222_v34 = vpop.eup %221 }
 0x109   :  { %v74_v35 = vmul.f32 %v220_v28, %v73_v33  ;;  %v80_v36 = vmul.f32 %v222_v34, %v68_v29  ;;  %vm86_vm5 = vweird.f32 %v222_v34 }
 0x10a   :  { %vm87_vm7 = vmor %vm85_vm6, %vm86_vm5 }
 0x10b   :  { %v81_v37 = vmul.f32 %v222_v34, %v80_v36  ;;  %v78_v38 = vsel %vm77_vm4, %v220_v28, %v74_v35 }
 0x10c   :  { %v89_v41 = vmul.f32 %v78_v38, %v55_v13 }
 0x10d   :  { %v82_v39 = vmul.f32 0.5, %v81_v37 }
 0x10e   :  { %v95_v46 = vmul.f32 %v214_v42, %v89_v41 }
 0x10f   :  { %v83_v40 = vsub.f32 1.5, %v82_v39 }
 0x110   :  { %v101_v49 = vadd.f32 %v215_v47, %v95_v46 }
 0x111   :  { %v84_v43 = vmul.f32 %v222_v34, %v83_v40 }
 0x113   :  { %v88_v44 = vsel %vm87_vm7, %v222_v34, %v84_v43 }
 0x114   :  { %v90_v45 = vmul.f32 %v88_v44, %v56_v18 }
 0x116   :  { %v96_v48 = vmul.f32 %v214_v42, %v90_v45 }
 0x118   :  { %v102_v50 = vadd.f32 %v215_v47, %v96_v48 }
 0x11a   :  { %v103_v51 = vpack.c.bf16 %v102_v50, %v101_v49 }
 0x11c   :  { %200 = vmatmul.msk.bf16.vlgmr.msra.gmra.mxu0 %vm39_vm0, %v103_v51 }
 0x199   :  { %v136_v53 = vpop.f32.mrf.mxu0 }
 0x19a   :  { %v137_v54 = vadd.f32 %v216_v52, %v136_v53 }
 0x19c   :  { %v201_v55 = vmul.f32 -1.702, %v137_v54 }
 0x19e   :  { %v145_v56 = vmul.f32 1.442695, %v201_v55 }
 0x1a0   :  { %223 = vpow2.f32 %v145_v56 }
 0x1a1   :  { %v138_v57 = vpop.f32.mrf.mxu0 }
 0x1a2   :  { %v139_v58 = vadd.f32 %v216_v52, %v138_v57 }
 0x1a4   :  { %v202_v59 = vmul.f32 -1.702, %v139_v58 }
 0x1a6   :  { %v224_v60 = vpop.eup %223  ;;  %v147_v61 = vmul.f32 1.442695, %v202_v59 }
 0x1a7   :  { %v149_v62 = vadd.f32 1.0, %v224_v60 }
 0x1a8   :  { %225 = vpow2.f32 %v147_v61 }
 0x1a9   :  { %227 = vrcp.f32 %v149_v62  ;;  %v162_v8 = vand.u32 2147483648, %v149_v62  ;;  %vm156_vm9 = vweird.f32 %v149_v62  ;;  %v160_v9 = vand.u32 2147483647, %v149_v62 }
 0x1ab   :  { %v163_v15 = vor.u32 1.1754944e-38, %v162_v8  ;;  %vm161_vm12 = vcmp.eq.f32.partialorder %v160_v9, 8.507059e+37 }
 0x1ae   :  { %v226_v63 = vpop.eup %225 }
 0x1af   :  { %v228_v0 = vpop.eup %227  ;;  %v150_v1 = vadd.f32 1.0, %v226_v63 }
 0x1b0   :  { %v152_v2 = vmul.f32 %v228_v0, %v149_v62  ;;  %vm157_vm8 = vweird.f32 %v228_v0 }
 0x1b1   :  { %229 = vrcp.f32 %v150_v1  ;;  %vm158_vm10 = vmor %vm156_vm9, %vm157_vm8  ;;  %v177_v11 = vand.u32 2147483648, %v150_v1  ;;  %v175_v14 = vand.u32 2147483647, %v150_v1  ;;  %vm171_vm13 = vweird.f32 %v150_v1 }
 0x1b2   :  { %v153_v3 = vsub.f32 1.0, %v152_v2 }
 0x1b3   :  { %v178_v18 = vor.u32 1.1754944e-38, %v177_v11  ;;  %vm176_vm15 = vcmp.eq.f32.partialorder %v175_v14, 8.507059e+37 }
 0x1b4   :  { %v154_v4 = vmul.f32 %v228_v0, %v153_v3 }
 0x1b6   :  { %v155_v6 = vadd.f32 %v228_v0, %v154_v4 }
 0x1b7   :  { %v230_v5 = vpop.eup %229 }
 0x1b8   :  { %v167_v7 = vmul.f32 %v230_v5, %v150_v1  ;;  %v159_v12 = vsel %vm158_vm10, %v228_v0, %v155_v6  ;;  %vm172_vm11 = vweird.f32 %v230_v5 }
 0x1b9   :  { %v164_v17 = vsel %vm161_vm12, %v163_v15, %v159_v12  ;;  %vm173_vm14 = vmor %vm171_vm13, %vm172_vm11 }
 0x1ba   :  { %v168_v10 = vsub.f32 1.0, %v167_v7  ;;  %v181_v21 = vmul.f32 %v164_v17, %v137_v54 }
 0x1bc   :  { %v169_v13 = vmul.f32 %v230_v5, %v168_v10 }
 0x1be   :  { %v170_v16 = vadd.f32 %v230_v5, %v169_v13 }
 0x1c0   :  { %v174_v19 = vsel %vm173_vm14, %v230_v5, %v170_v16 }
 0x1c1   :  { %v179_v20 = vsel %vm176_vm15, %v178_v18, %v174_v19 }
 0x1c2   :  { %v182_v22 = vmul.f32 %v179_v20, %v139_v58 }
 0x1c4   :  { %v208_v23 = vpack.c.bf16 %v182_v22, %v181_v21 }
 0x1c6   :  { %209 = vst [vmem:[%s322_s5] sm:$0xff] %v208_v23  }
 0x1c7   :  { %191 = vsyncpa [#allocation3], 1 }

// kernel: transformer_forward.14
= control target key start
LH: loop header
LB: loop body
LE: loop exit
PB: predicated region body
PF: predicated region fallthrough
CT: control target
= control target key end

     0   :  { %vm111_vm0 = vcmask 261120   ;;  %s231_s1 = inlined_call_operand.vmem [shape: bf16[128,32], index: 1, kind: input, shape index: {}]   ;;  %s232_s2 = inlined_call_operand.vmem [shape: f32[1,32], index: 2, kind: input, shape index: {}]   ;;  %s233_s0 = inlined_call_operand.vmem [shape: bf16[16,128], index: 0, kind: input, shape index: {}]   ;;  %s234_s3 = inlined_call_operand.vmem [shape: f32[16,32], index: 3, kind: input, shape index: {}]   ;;  %s235_s4 = inlined_call_operand.vmem [shape: f32[16,32], index: 4, kind: output, shape index: {}]  }
   0x1   :  { %v162_v0 = vld [vmem:[%s231_s1 + $0x38] sm:$0xff]  ;;  %v161_v1 = vld [vmem:[%s231_s1 + $0x30] sm:$0xff]  ;;  %v160_v2 = vld [vmem:[%s231_s1 + $0x28] sm:$0xff] }
   0x2   :  { %93 = vmatpush.bf16.msra.mxu0 %v162_v0  ;;  %v159_v3 = vld [vmem:[%s231_s1 + $0x20] sm:$0xff]  ;;  %v158_v4 = vld [vmem:[%s231_s1 + $0x18] sm:$0xff]  ;;  %v157_v5 = vld [vmem:[%s231_s1 + $0x10] sm:$0xff] }
   0x3   :  { %v156_v6 = vld [vmem:[%s231_s1 + $0x8] sm:$0xff]  ;;  %v155_v7 = vld [vmem:[%s231_s1] sm:$0xff] }
   0x4   :  { %v154_v8 = vld [vmem:[%s233_s0] sm:$0xff]  ;;  %v108_v15 = vld [vmem:[%s234_s3 + $0x8] sm:$0xff] }
   0x5   :  { %v163_v9 = vld [vmem:[%s232_s2] ss:$0 sm:$0xff] }
   0x6   :  { %94 = vmatpush.bf16.msra.mxu0 %v161_v1  ;;  %v107_v11 = vld [vmem:[%s234_s3] sm:$0xff] }
   0xa   :  { %95 = vmatpush.bf16.msra.mxu0 %v160_v2 }
   0xe   :  { %96 = vmatpush.bf16.msra.mxu0 %v159_v3 }
  0x12   :  { %97 = vmatpush.bf16.msra.mxu0 %v158_v4 }
  0x16   :  { %98 = vmatpush.bf16.msra.mxu0 %v157_v5 }
  0x1a   :  { %99 = vmatpush.bf16.msra.mxu0 %v156_v6 }
  0x1e   :  { %100 = vmatpush.bf16.msra.mxu0 %v155_v7 }
  0x21   :  { %101 = vmatmul.bf16.vlgmr.msra.gmra.mxu0 %v154_v8 }
  0x9e   :  { %v102_v10 = vpop.f32.mrf.mxu0 }
  0x9f   :  { %v103_v12 = vadd.f32 %v163_v9, %v102_v10 }
  0xa1   :  { %v109_v13 = vadd.f32 %v107_v11, %v103_v12 }
  0xa3   :  { %112 = vst.msk [vmem:[%s235_s4] sm:$0xff] %vm111_vm0, %v109_v13 }
  0xa6   :  { %v104_v14 = vpop.f32.mrf.mxu0 }
  0xa7   :  { %v105_v16 = vadd.f32 %v163_v9, %v104_v14 }
  0xa9   :  { %v110_v17 = vadd.f32 %v108_v15, %v105_v16 }
  0xab   :  { %113 = vst.msk [vmem:[%s235_s4 + $0x8] sm:$0xff] %vm111_vm0, %v110_v17 }

// kernel: transformer_forward.17
= control target key start
LH: loop header
LB: loop body
LE: loop exit
PB: predicated region body
PF: predicated region fallthrough
CT: control target
= control target key end

     0   :  { %vm45_vm0 = vcmask 261120   ;;  %s139_s1 = inlined_call_operand.vmem [shape: bf16[32,32], index: 1, kind: input, shape index: {}]   ;;  %s140_s2 = inlined_call_operand.vmem [shape: f32[1,32], index: 2, kind: input, shape index: {}]   ;;  %s141_s0 = inlined_call_operand.vmem [shape: bf16[16,32], index: 0, kind: input, shape index: {}]   ;;  %s142_s3 = inlined_call_operand.vmem [shape: f32[16,32], index: 3, kind: input, shape index: {}]   ;;  %s143_s4 = inlined_call_operand.vmem [shape: f32[16,32], index: 4, kind: output, shape index: {}]  }
   0x1   :  { %v88_v0 = vld [vmem:[%s139_s1 + $0x8] sm:$0xff]  ;;  %v87_v1 = vld [vmem:[%s139_s1] sm:$0xff] }
   0x2   :  { %55 = vmatpush.bf16.msra.mxu0 %v88_v0  ;;  %v86_v2 = vld [vmem:[%s141_s0] sm:$0xff]  ;;  %v64_v9 = vld [vmem:[%s142_s3 + $0x8] sm:$0xff] }
   0x3   :  { %v89_v3 = vld [vmem:[%s140_s2] ss:$0 sm:$0xff] }
   0x4   :  { %v63_v5 = vld [vmem:[%s142_s3] sm:$0xff] }
   0x6   :  { %56 = vmatpush.bf16.msra.mxu0 %v87_v1 }
   0x9   :  { %85 = vmatmul.msk.bf16.vlgmr.msra.gmra.mxu0 %vm45_vm0, %v86_v2 }
  0x86   :  { %v58_v4 = vpop.f32.mrf.mxu0 }
  0x87   :  { %v59_v6 = vadd.f32 %v89_v3, %v58_v4 }
  0x89   :  { %v65_v7 = vadd.f32 %v63_v5, %v59_v6 }
  0x8b   :  { %67 = vst.msk [vmem:[%s143_s4] sm:$0xff] %vm45_vm0, %v65_v7 }
  0x8e   :  { %v60_v8 = vpop.f32.mrf.mxu0 }
  0x8f   :  { %v61_v10 = vadd.f32 %v89_v3, %v60_v8 }
  0x91   :  { %v66_v11 = vadd.f32 %v64_v9, %v61_v10 }
  0x93   :  { %68 = vst.msk [vmem:[%s143_s4 + $0x8] sm:$0xff] %vm45_vm0, %v66_v11 }

// kernel: transformer_forward.18
= control target key start
LH: loop header
LB: loop body
LE: loop exit
PB: predicated region body
PF: predicated region fallthrough
CT: control target
= control target key end

     0   :  { %vm23_vm0 = vcmask 261120   ;;  %v211_v4 = vmov 32.0   ;;  %s271_s0 = inlined_call_operand.vmem [shape: f32[16,32], index: 0, kind: input, shape index: {}]   ;;  %s272_s3 = inlined_call_operand.vmem [shape: f32[1,32], index: 3, kind: input, shape index: {}]   ;;  %s273_s4 = inlined_call_operand.vmem [shape: f32[1,32], index: 4, kind: input, shape index: {}]   ;;  %s274_s2 = inlined_call_operand.vmem [shape: f32[1,128], index: 2, kind: input, shape index: {}]   ;;  %s275_s1 = inlined_call_operand.vmem [shape: bf16[32,128], index: 1, kind: input, shape index: {}]   ;;  %s276_s5 = inlined_call_operand.vmem [shape: bf16[16,128], index: 5, kind: output, shape index: {}]  }
   0x1   :  { %v21_v0 = vld [vmem:[%s271_s0] sm:$0xff]  ;;  %v22_v2 = vld [vmem:[%s271_s0 + $0x8] sm:$0xff]  ;;  %197 = vrcp.f32 %v211_v4 }
   0x2   :  { %v24_v1 = vsel %vm23_vm0, %v21_v0, 0.0  ;;  %v27_v3 = vsel %vm23_vm0, %v22_v2, 0.0  ;;  %v187_v21 = vld [vmem:[%s275_s1 + $0x8] sm:$0xff]  ;;  %v186_v23 = vld [vmem:[%s275_s1] sm:$0xff] }
   0x3   :  { %25 = vadd.xlane.f32.xlu0 %v24_v1  ;;  %117 = vmatpush.bf16.msra.mxu0 %v187_v21  ;;  %v194_v42 = vld [vmem:[%s272_s3] ss:$0 sm:$0xff] }
   0x4   :  { %v195_v47 = vld [vmem:[%s273_s4] ss:$0 sm:$0xff] }
   0x5   :  { %v196_v52 = vld [vmem:[%s274_s2] ss:$0 sm:$0xff] }
   0x7   :  { %v198_v5 = vpop.eup %197  ;;  %118 = vmatpush.bf16.msra.mxu0 %v186_v23 }
   0x8   :  { %v31_v6 = vmul.f32 32.0, %v198_v5  ;;  %vm35_vm1 = vweird.f32 %v198_v5 }
   0xa   :  { %v32_v7 = vsub.f32 1.0, %v31_v6 }
   0xb   :  { %28 = vadd.xlane.f32.xlu0 %v27_v3 }
   0xc   :  { %v33_v8 = vmul.f32 %v198_v5, %v32_v7 }
   0xe   :  { %v34_v9 = vadd.f32 %v198_v5, %v33_v8 }
  0x10   :  { %v36_v10 = vsel %vm35_vm1, %v198_v5, %v34_v9 }
  0x76   :  { %v26_v11 = vpop.xlane.xlu0 %25 }
  0x77   :  { %v37_v12 = vmul.f32 %v36_v10, %v26_v11 }
  0x79   :  { %v39_v13 = vsub.f32 %v21_v0, %v37_v12 }
  0x7b   :  { %v41_v14 = vmul.f32 %v39_v13, %v39_v13 }
  0x7d   :  { %v43_v15 = vsel %vm23_vm0, %v41_v14, 0.0 }
  0x7e   :  { %44 = vadd.xlane.f32.xlu1 %v43_v15  ;;  %v29_v16 = vpop.xlane.xlu0 %28 }
  0x7f   :  { %v38_v17 = vmul.f32 %v36_v10, %v29_v16 }
  0x81   :  { %v40_v18 = vsub.f32 %v22_v2, %v38_v17 }
  0x83   :  { %v42_v19 = vmul.f32 %v40_v18, %v40_v18 }
  0x85   :  { %v46_v20 = vsel %vm23_vm0, %v42_v19, 0.0 }
  0x86   :  { %47 = vadd.xlane.f32.xlu1 %v46_v20 }
  0xf1   :  { %v45_v22 = vpop.xlane.xlu1 %44 }
  0xf2   :  { %v49_v24 = vmul.f32 %v45_v22, %v36_v10 }
  0xf4   :  { %v51_v25 = vadd.f32 1e-05, %v49_v24 }
  0xf6   :  { %199 = vrsqrt.f32 %v51_v25  ;;  %vm59_vm3 = vweird.f32 %v51_v25 }
  0xf9   :  { %v48_v26 = vpop.xlane.xlu1 %47 }
  0xfa   :  { %v50_v27 = vmul.f32 %v48_v26, %v36_v10 }
  0xfc   :  { %v200_v28 = vpop.eup %199  ;;  %v52_v29 = vadd.f32 1e-05, %v50_v27 }
  0xfd   :  { %v54_v30 = vmul.f32 %v200_v28, %v51_v25  ;;  %vm60_vm2 = vweird.f32 %v200_v28 }
  0xfe   :  { %201 = vrsqrt.f32 %v52_v29  ;;  %vm61_vm4 = vmor %vm59_vm3, %vm60_vm2  ;;  %vm69_vm6 = vweird.f32 %v52_v29 }
  0xff   :  { %v55_v31 = vmul.f32 %v200_v28, %v54_v30 }
 0x101   :  { %v56_v32 = vmul.f32 0.5, %v55_v31 }
 0x103   :  { %v57_v33 = vsub.f32 1.5, %v56_v32 }
 0x104   :  { %v202_v34 = vpop.eup %201 }
 0x105   :  { %v58_v35 = vmul.f32 %v200_v28, %v57_v33  ;;  %v64_v36 = vmul.f32 %v202_v34, %v52_v29  ;;  %vm70_vm5 = vweird.f32 %v202_v34 }
 0x106   :  { %vm71_vm7 = vmor %vm69_vm6, %vm70_vm5 }
 0x107   :  { %v65_v37 = vmul.f32 %v202_v34, %v64_v36  ;;  %v62_v38 = vsel %vm61_vm4, %v200_v28, %v58_v35 }
 0x108   :  { %v73_v41 = vmul.f32 %v62_v38, %v39_v13 }
 0x109   :  { %v66_v39 = vmul.f32 0.5, %v65_v37 }
 0x10a   :  { %v79_v46 = vmul.f32 %v194_v42, %v73_v41 }
 0x10b   :  { %v67_v40 = vsub.f32 1.5, %v66_v39 }
 0x10c   :  { %v85_v49 = vadd.f32 %v195_v47, %v79_v46 }
 0x10d   :  { %v68_v43 = vmul.f32 %v202_v34, %v67_v40 }
 0x10f   :  { %v72_v44 = vsel %vm71_vm7, %v202_v34, %v68_v43 }
 0x110   :  { %v74_v45 = vmul.f32 %v72_v44, %v40_v18 }
 0x112   :  { %v80_v48 = vmul.f32 %v194_v42, %v74_v45 }
 0x114   :  { %v86_v50 = vadd.f32 %v195_v47, %v80_v48 }
 0x116   :  { %v87_v51 = vpack.c.bf16 %v86_v50, %v85_v49 }
 0x118   :  { %183 = vmatmul.msk.bf16.vlgmr.msra.gmra.mxu0 %vm23_vm0, %v87_v51 }
 0x195   :  { %v120_v53 = vpop.f32.mrf.mxu0 }
 0x196   :  { %v121_v54 = vadd.f32 %v196_v52, %v120_v53 }
 0x198   :  { %v184_v55 = vmul.f32 -1.702, %v121_v54 }
 0x19a   :  { %v129_v56 = vmul.f32 1.442695, %v184_v55 }
 0x19c   :  { %203 = vpow2.f32 %v129_v56 }
 0x19d   :  { %v122_v57 = vpop.f32.mrf.mxu0 }
 0x19e   :  { %v123_v58 = vadd.f32 %v196_v52, %v122_v57 }
 0x1a0   :  { %v185_v59 = vmul.f32 -1.702, %v123_v58 }
 0x1a2   :  { %v204_v60 = vpop.eup %203  ;;  %v131_v61 = vmul.f32 1.442695, %v185_v59 }
 0x1a3   :  { %v133_v62 = vadd.f32 1.0, %v204_v60 }
 0x1a4   :  { %205 = vpow2.f32 %v131_v61 }
 0x1a5   :  { %207 = vrcp.f32 %v133_v62  ;;  %v146_v8 = vand.u32 2147483648, %v133_v62  ;;  %vm140_vm9 = vweird.f32 %v133_v62  ;;  %v144_v9 = vand.u32 2147483647, %v133_v62 }
 0x1a7   :  { %v147_v15 = vor.u32 1.1754944e-38, %v146_v8  ;;  %vm145_vm12 = vcmp.eq.f32.partialorder %v144_v9, 8.507059e+37 }
 0x1aa   :  { %v206_v63 = vpop.eup %205 }
 0x1ab   :  { %v208_v0 = vpop.eup %207  ;;  %v134_v1 = vadd.f32 1.0, %v206_v63 }
 0x1ac   :  { %v136_v2 = vmul.f32 %v208_v0, %v133_v62  ;;  %vm141_vm8 = vweird.f32 %v208_v0 }
 0x1ad   :  { %209 = vrcp.f32 %v134_v1  ;;  %vm142_vm10 = vmor %vm140_vm9, %vm141_vm8  ;;  %v161_v11 = vand.u32 2147483648, %v134_v1  ;;  %v159_v14 = vand.u32 2147483647, %v134_v1  ;;  %vm155_vm13 = vweird.f32 %v134_v1 }
 0x1ae   :  { %v137_v3 = vsub.f32 1.0, %v136_v2 }
 0x1af   :  { %v162_v18 = vor.u32 1.1754944e-38, %v161_v11  ;;  %vm160_vm15 = vcmp.eq.f32.partialorder %v159_v14, 8.507059e+37 }
 0x1b0   :  { %v138_v4 = vmul.f32 %v208_v0, %v137_v3 }
 0x1b2   :  { %v139_v6 = vadd.f32 %v208_v0, %v138_v4 }
 0x1b3   :  { %v210_v5 = vpop.eup %209 }
 0x1b4   :  { %v151_v7 = vmul.f32 %v210_v5, %v134_v1  ;;  %v143_v12 = vsel %vm142_vm10, %v208_v0, %v139_v6  ;;  %vm156_vm11 = vweird.f32 %v210_v5 }
 0x1b5   :  { %v148_v17 = vsel %vm145_vm12, %v147_v15, %v143_v12  ;;  %vm157_vm14 = vmor %vm155_vm13, %vm156_vm11 }
 0x1b6   :  { %v152_v10 = vsub.f32 1.0, %v151_v7  ;;  %v165_v21 = vmul.f32 %v148_v17, %v121_v54 }
 0x1b8   :  { %v153_v13 = vmul.f32 %v210_v5, %v152_v10 }
 0x1ba   :  { %v154_v16 = vadd.f32 %v210_v5, %v153_v13 }
 0x1bc   :  { %v158_v19 = vsel %vm157_vm14, %v210_v5, %v154_v16 }
 0x1bd   :  { %v163_v20 = vsel %vm160_vm15, %v162_v18, %v158_v19 }
 0x1be   :  { %v166_v22 = vmul.f32 %v163_v20, %v123_v58 }
 0x1c0   :  { %v191_v23 = vpack.c.bf16 %v166_v22, %v165_v21 }
 0x1c2   :  { %192 = vst [vmem:[%s276_s5] sm:$0xff] %v191_v23  }

</bundles_post_ra>
